<compile_context>
chip_gen: v5e
topology: v5e:2x2
jax: 0.10.0
libtpu: 0.0.40
codegen_flags: <defaults>
</compile_context>

<pallas_src>
import functools
import math

import jax
import jax.numpy as jnp
from jax.experimental import pallas as pl
from jax.experimental.pallas import tpu as pltpu


# --------------------------------------------------------------------------
# Pallas kernel
# --------------------------------------------------------------------------
def locglo_kernel(
    x_ref,                                    # (T*B, F)  time-major flattened
    wih1_ref, whh1_ref, bih1_ref, bhh1_ref,   # global (film) GRU params
    w_beta_ref, b_beta_ref,                   # (H1, F), (1, F)
    w_theta_ref, b_theta_ref,                 # (H1, F), (1, F)
    wih2_ref, whh2_ref, bih2_ref, bhh2_ref,   # local GRU params
    w_alpha_ref, b_alpha_ref,                 # (H2, F), (1, F)
    w_dense_ref, b_dense_ref,                 # (F, 1), (1, 1)
    out_ref,                                  # (B, 1)
    *, T, B,
):
    F = x_ref.shape[1]
    H1 = whh1_ref.shape[0]
    H2 = whh2_ref.shape[0]
    f32 = jnp.float32

    x = x_ref[...]                                   # (T*B, F)

    # ---- load params once; pre-split hh weights per gate block (hoisted) ----
    wih1 = wih1_ref[...]                             # (F, 3*H1)
    whh1 = whh1_ref[...]                             # (H1, 3*H1)
    bih1 = bih1_ref[...]                             # (1, 3*H1)
    bhh1 = bhh1_ref[...]                             # (1, 3*H1)
    whh1_rz, whh1_n = whh1[:, :2 * H1], whh1[:, 2 * H1:]
    bhh1_rz, bhh1_n = bhh1[:, :2 * H1], bhh1[:, 2 * H1:]

    wih2 = wih2_ref[...]                             # (F, 3*H2)
    whh2 = whh2_ref[...]                             # (H2, 3*H2)
    bih2 = bih2_ref[...]                             # (1, 3*H2)
    bhh2 = bhh2_ref[...]                             # (1, 3*H2)
    whh2_rz, whh2_n = whh2[:, :2 * H2], whh2[:, 2 * H2:]
    bhh2_rz, bhh2_n = bhh2[:, :2 * H2], bhh2[:, 2 * H2:]

    w_beta, b_beta = w_beta_ref[...], b_beta_ref[...]      # (H1,F), (1,F)
    w_theta, b_theta = w_theta_ref[...], b_theta_ref[...]  # (H1,F), (1,F)
    w_alpha, b_alpha = w_alpha_ref[...], b_alpha_ref[...]  # (H2,F), (1,F)

    def gru_cell(gi_rz, gi_n, h, w_rz, w_n, b_rz, b_n, H):
        # PyTorch GRU cell, gate order (r, z, n); input projection is prehoisted.
        gh_rz = jnp.dot(h, w_rz, preferred_element_type=f32) + b_rz   # (B, 2H)
        gh_n = jnp.dot(h, w_n, preferred_element_type=f32) + b_n      # (B, H)
        rz = jax.nn.sigmoid(gi_rz + gh_rz)                            # fused r|z
        r = rz[:, :H]
        z = rz[:, H:]
        n = jnp.tanh(gi_n + r * gh_n)
        return (1.0 - z) * n + z * h

    # ---------------- Stage 1: global (film) GRU + mean over time ----------
    gi1 = jnp.dot(x, wih1, preferred_element_type=f32) + bih1          # (T*B, 3H1)
    gi1_rz = gi1[:, :2 * H1]
    gi1_n = gi1[:, 2 * H1:]

    h = jnp.zeros((B, H1), f32)
    q_sum = jnp.zeros((B, H1), f32)
    for t in range(T):                                 # fully unrolled (T=8)
        lo = t * B
        h = gru_cell(gi1_rz[lo:lo + B], gi1_n[lo:lo + B], h,
                     whh1_rz, whh1_n, bhh1_rz, bhh1_n, H1)
        q_sum = q_sum + h
    S = q_sum * (1.0 / T)                                              # (B, H1)

    beta = jnp.dot(S, w_beta, preferred_element_type=f32) + b_beta     # (B, F)
    theta = jnp.dot(S, w_theta, preferred_element_type=f32) + b_theta  # (B, F)

    beta_t = jnp.concatenate([beta] * T, axis=0)                       # (T*B, F)
    theta_t = jnp.concatenate([theta] * T, axis=0)                     # (T*B, F)
    x_mod = beta_t * x + theta_t                                       # (T*B, F)

    # ---------------- Stage 2: local GRU on FiLM-modulated x ---------------
    gi2 = jnp.dot(x_mod, wih2, preferred_element_type=f32) + bih2      # (T*B, 3H2)
    gi2_rz = gi2[:, :2 * H2]
    gi2_n = gi2[:, 2 * H2:]

    h = jnp.zeros((B, H2), f32)
    hs = []
    for t in range(T):                                 # fully unrolled (T=8)
        lo = t * B
        h = gru_cell(gi2_rz[lo:lo + B], gi2_n[lo:lo + B], h,
                     whh2_rz, whh2_n, bhh2_rz, bhh2_n, H2)
        hs.append(h)
    h_all = jnp.concatenate(hs, axis=0)                                # (T*B, H2)

    # ---- hoisted alpha projection + vectorized time reduction -------------
    alpha = jnp.tanh(
        jnp.dot(h_all, w_alpha, preferred_element_type=f32) + b_alpha
    )                                                                  # (T*B, F)
    xi = alpha + beta_t                                                # (T*B, F)
    prod = xi * x_mod                                                  # (T*B, F)

    c = jnp.zeros((B, F), f32)
    for t in range(T):                                 # static-slice tree of adds
        c = c + prod[t * B:(t + 1) * B]

    logits = jnp.dot(c, w_dense_ref[...], preferred_element_type=f32) \
        + b_dense_ref[...]                                             # (B, 1)
    out_ref[...] = jax.nn.sigmoid(logits)


# --------------------------------------------------------------------------
# Wrapper
# --------------------------------------------------------------------------
def locglo_forward(x, params):
    """x: (B, T, F) batch_first (PyTorch convention). Returns (B, 1)."""
    B, T, F = x.shape
    # One-time 2 KiB rearrangement to time-major rows (row = t*B + b); the
    # kernel no longer slices x per timestep, only the prehoisted projections.
    x_tm = jnp.transpose(x, (1, 0, 2)).reshape(T * B, F)

    inputs = (
        x_tm,
        params["wih1"], params["whh1"], params["bih1"], params["bhh1"],
        params["w_beta"], params["b_beta"], params["w_theta"], params["b_theta"],
        params["wih2"], params["whh2"], params["bih2"], params["bhh2"],
        params["w_alpha"], params["b_alpha"],
        params["w_dense"], params["b_dense"],
    )

    vmem_spec = pl.BlockSpec(memory_space=pltpu.MemorySpace.VMEM)
    kernel = functools.partial(locglo_kernel, T=T, B=B)
    return pl.pallas_call(
        kernel,
        out_shape=jax.ShapeDtypeStruct((B, 1), jnp.float32),
        in_specs=[vmem_spec] * len(inputs),
        out_specs=vmem_spec,
    )(*inputs)


# --------------------------------------------------------------------------
# Deterministic parameter init (mirrors LocgloModel.__init__/reset_parameters)
# --------------------------------------------------------------------------
def init_params(key, fea_dim, film_rnn_dim, rnn_dim):
    keys = jax.random.split(key, 16)
    ki = iter(keys)

    def uniform(k, shape, bound):
        return jax.random.uniform(k, shape, jnp.float32, -bound, bound)

    H1, H2, F = film_rnn_dim, rnn_dim, fea_dim
    b1 = 1.0 / math.sqrt(H1)
    b2 = 1.0 / math.sqrt(H2)
    bd = 1.0 / math.sqrt(F)

    params = {
        # film GRU (PyTorch stores (3H, in); we pre-transpose for the kernel)
        "wih1": uniform(next(ki), (3 * H1, F), b1).T,           # (F, 3H1)
        "whh1": uniform(next(ki), (3 * H1, H1), b1).T,          # (H1, 3H1)
        "bih1": uniform(next(ki), (1, 3 * H1), b1),
        "bhh1": uniform(next(ki), (1, 3 * H1), b1),
        # FiLM projections
        "w_beta": uniform(next(ki), (H1, F), b1),
        "b_beta": uniform(next(ki), (1, F), b1),
        "w_theta": uniform(next(ki), (H1, F), b1),
        "b_theta": uniform(next(ki), (1, F), b1),
        # local GRU
        "wih2": uniform(next(ki), (3 * H2, F), b2).T,           # (F, 3H2)
        "whh2": uniform(next(ki), (3 * H2, H2), b2).T,          # (H2, 3H2)
        "bih2": uniform(next(ki), (1, 3 * H2), b2),
        "bhh2": uniform(next(ki), (1, 3 * H2), b2),
        # alpha projection
        "w_alpha": uniform(next(ki), (H2, F), b2),
        "b_alpha": uniform(next(ki), (1, F), b2),
        # dense head (nn.Linear(F, 1))
        "w_dense": uniform(next(ki), (F, 1), bd),
        "b_dense": uniform(next(ki), (1, 1), bd),
    }
    return params


# --------------------------------------------------------------------------
# Pure-JAX reference (same math as the PyTorch forward) for validation
# --------------------------------------------------------------------------
def locglo_reference(x, p):
    B, T, F = x.shape
    H1 = p["whh1"].shape[0]
    H2 = p["whh2"].shape[0]

    def gru_scan(x_seq, wih, whh, bih, bhh, H):
        def step(h, x_t):
            gi = x_t @ wih + bih
            gh = h @ whh + bhh
            r = jax.nn.sigmoid(gi[:, :H] + gh[:, :H])
            z = jax.nn.sigmoid(gi[:, H:2 * H] + gh[:, H:2 * H])
            n = jnp.tanh(gi[:, 2 * H:] + r * gh[:, 2 * H:])
            h_new = (1.0 - z) * n + z * h
            return h_new, h_new
        h0 = jnp.zeros((x_seq.shape[1], H), jnp.float32)
        _, hs = jax.lax.scan(step, h0, x_seq)              # (T, B, H)
        return hs

    x_tm = jnp.transpose(x, (1, 0, 2))                     # (T, B, F)
    q = gru_scan(x_tm, p["wih1"], p["whh1"], p["bih1"], p["bhh1"], H1)
    S = jnp.mean(q, axis=0)                                # (B, H1)
    beta = S @ p["w_beta"] + p["b_beta"]                   # (B, F)
    theta = S @ p["w_theta"] + p["b_theta"]                # (B, F)

    x_mod = beta[None] * x_tm + theta[None]                # (T, B, F)
    h = gru_scan(x_mod, p["wih2"], p["whh2"], p["bih2"], p["bhh2"], H2)
    alpha = jnp.tanh(h @ p["w_alpha"] + p["b_alpha"])      # (T, B, F)
    xi = alpha + beta[None]
    c = jnp.sum(xi * x_mod, axis=0)                        # (B, F)
    return jax.nn.sigmoid(c @ p["w_dense"] + p["b_dense"])  # (B, 1)


# --------------------------------------------------------------------------
if __name__ == "__main__":
    # args = {'global': True, 'local': True, 'bidirect': False,
    #         'fea_dim': 32, 'film_rnn_dim': 32, 'rnn_dim': 32}
    B, T, F = 2, 8, 32
    H1, H2 = 32, 32

    key = jax.random.PRNGKey(0)
    k_x, k_p = jax.random.split(key)
    x = jax.random.normal(k_x, (B, T, F), jnp.float32)     # (batch, time, fea_dim)
    params = init_params(k_p, F, H1, H2)

    out = jax.block_until_ready(locglo_forward(x, params))
    ref = jax.block_until_ready(locglo_reference(x, params))

    assert out.shape == (B, 1)
    assert jnp.allclose(out, ref, rtol=2e-3, atol=2e-3), (out, ref)
    print("KERNEL_OK")
</pallas_src>

<mosaic_0001>
module attributes {stable_mosaic.version = 11 : i64} {
  func.func @locglo_kernel(%arg0: memref<16x32xf32, #tpu.memory_space<vmem>>, %arg1: memref<32x96xf32, #tpu.memory_space<vmem>>, %arg2: memref<32x96xf32, #tpu.memory_space<vmem>>, %arg3: memref<1x96xf32, #tpu.memory_space<vmem>>, %arg4: memref<1x96xf32, #tpu.memory_space<vmem>>, %arg5: memref<32x32xf32, #tpu.memory_space<vmem>>, %arg6: memref<1x32xf32, #tpu.memory_space<vmem>>, %arg7: memref<32x32xf32, #tpu.memory_space<vmem>>, %arg8: memref<1x32xf32, #tpu.memory_space<vmem>>, %arg9: memref<32x96xf32, #tpu.memory_space<vmem>>, %arg10: memref<32x96xf32, #tpu.memory_space<vmem>>, %arg11: memref<1x96xf32, #tpu.memory_space<vmem>>, %arg12: memref<1x96xf32, #tpu.memory_space<vmem>>, %arg13: memref<32x32xf32, #tpu.memory_space<vmem>>, %arg14: memref<1x32xf32, #tpu.memory_space<vmem>>, %arg15: memref<32x1xf32, #tpu.memory_space<vmem>>, %arg16: memref<1x1xf32, #tpu.memory_space<vmem>>, %arg17: memref<2x1xf32, #tpu.memory_space<vmem>>) attributes {dimension_semantics = [], scalar_prefetch = 0 : i64, scratch_operands = 0 : i64, tpu.core_type = #tpu.core_type<tc>} {
    %c0 = arith.constant 0 : index
    %c0_0 = arith.constant 0 : index
    %0 = vector.load %arg0[%c0, %c0_0] : memref<16x32xf32, #tpu.memory_space<vmem>>, vector<16x32xf32>
    %c0_1 = arith.constant 0 : index
    %c0_2 = arith.constant 0 : index
    %1 = vector.load %arg1[%c0_1, %c0_2] : memref<32x96xf32, #tpu.memory_space<vmem>>, vector<32x96xf32>
    %c0_3 = arith.constant 0 : index
    %c0_4 = arith.constant 0 : index
    %2 = vector.load %arg2[%c0_3, %c0_4] : memref<32x96xf32, #tpu.memory_space<vmem>>, vector<32x96xf32>
    %c0_5 = arith.constant 0 : index
    %c0_6 = arith.constant 0 : index
    %3 = vector.load %arg3[%c0_5, %c0_6] : memref<1x96xf32, #tpu.memory_space<vmem>>, vector<1x96xf32>
    %c0_7 = arith.constant 0 : index
    %c0_8 = arith.constant 0 : index
    %4 = vector.load %arg4[%c0_7, %c0_8] : memref<1x96xf32, #tpu.memory_space<vmem>>, vector<1x96xf32>
    %5 = vector.extract_strided_slice %2 {offsets = [0, 0], sizes = [32, 64], strides = [1, 1]} : vector<32x96xf32> to vector<32x64xf32>
    %6 = vector.extract_strided_slice %2 {offsets = [0, 64], sizes = [32, 32], strides = [1, 1]} : vector<32x96xf32> to vector<32x32xf32>
    %7 = vector.extract_strided_slice %4 {offsets = [0, 0], sizes = [1, 64], strides = [1, 1]} : vector<1x96xf32> to vector<1x64xf32>
    %8 = vector.extract_strided_slice %4 {offsets = [0, 64], sizes = [1, 32], strides = [1, 1]} : vector<1x96xf32> to vector<1x32xf32>
    %c0_9 = arith.constant 0 : index
    %c0_10 = arith.constant 0 : index
    %9 = vector.load %arg9[%c0_9, %c0_10] : memref<32x96xf32, #tpu.memory_space<vmem>>, vector<32x96xf32>
    %c0_11 = arith.constant 0 : index
    %c0_12 = arith.constant 0 : index
    %10 = vector.load %arg10[%c0_11, %c0_12] : memref<32x96xf32, #tpu.memory_space<vmem>>, vector<32x96xf32>
    %c0_13 = arith.constant 0 : index
    %c0_14 = arith.constant 0 : index
    %11 = vector.load %arg11[%c0_13, %c0_14] : memref<1x96xf32, #tpu.memory_space<vmem>>, vector<1x96xf32>
    %c0_15 = arith.constant 0 : index
    %c0_16 = arith.constant 0 : index
    %12 = vector.load %arg12[%c0_15, %c0_16] : memref<1x96xf32, #tpu.memory_space<vmem>>, vector<1x96xf32>
    %13 = vector.extract_strided_slice %10 {offsets = [0, 0], sizes = [32, 64], strides = [1, 1]} : vector<32x96xf32> to vector<32x64xf32>
    %14 = vector.extract_strided_slice %10 {offsets = [0, 64], sizes = [32, 32], strides = [1, 1]} : vector<32x96xf32> to vector<32x32xf32>
    %15 = vector.extract_strided_slice %12 {offsets = [0, 0], sizes = [1, 64], strides = [1, 1]} : vector<1x96xf32> to vector<1x64xf32>
    %16 = vector.extract_strided_slice %12 {offsets = [0, 64], sizes = [1, 32], strides = [1, 1]} : vector<1x96xf32> to vector<1x32xf32>
    %c0_17 = arith.constant 0 : index
    %c0_18 = arith.constant 0 : index
    %17 = vector.load %arg5[%c0_17, %c0_18] : memref<32x32xf32, #tpu.memory_space<vmem>>, vector<32x32xf32>
    %c0_19 = arith.constant 0 : index
    %c0_20 = arith.constant 0 : index
    %18 = vector.load %arg6[%c0_19, %c0_20] : memref<1x32xf32, #tpu.memory_space<vmem>>, vector<1x32xf32>
    %c0_21 = arith.constant 0 : index
    %c0_22 = arith.constant 0 : index
    %19 = vector.load %arg7[%c0_21, %c0_22] : memref<32x32xf32, #tpu.memory_space<vmem>>, vector<32x32xf32>
    %c0_23 = arith.constant 0 : index
    %c0_24 = arith.constant 0 : index
    %20 = vector.load %arg8[%c0_23, %c0_24] : memref<1x32xf32, #tpu.memory_space<vmem>>, vector<1x32xf32>
    %c0_25 = arith.constant 0 : index
    %c0_26 = arith.constant 0 : index
    %21 = vector.load %arg13[%c0_25, %c0_26] : memref<32x32xf32, #tpu.memory_space<vmem>>, vector<32x32xf32>
    %c0_27 = arith.constant 0 : index
    %c0_28 = arith.constant 0 : index
    %22 = vector.load %arg14[%c0_27, %c0_28] : memref<1x32xf32, #tpu.memory_space<vmem>>, vector<1x32xf32>
    %cst = arith.constant dense<0.000000e+00> : vector<16x96xf32>
    %23 = tpu.matmul %0, %1, %cst {dimension_numbers = #tpu.dot_dimension_numbers<[1], [0], [0], [1], [0, 0, 1, 1], [], []>} : vector<16x32xf32>, vector<32x96xf32>, vector<16x96xf32> -> vector<16x96xf32>
    %24 = vector.broadcast %3 : vector<1x96xf32> to vector<16x96xf32>
    %25 = arith.addf %23, %24 : vector<16x96xf32>
    %26 = vector.extract_strided_slice %25 {offsets = [0, 0], sizes = [16, 64], strides = [1, 1]} : vector<16x96xf32> to vector<16x64xf32>
    %27 = vector.extract_strided_slice %25 {offsets = [0, 64], sizes = [16, 32], strides = [1, 1]} : vector<16x96xf32> to vector<16x32xf32>
    %cst_29 = arith.constant 0.000000e+00 : f32
    %28 = vector.broadcast %cst_29 : f32 to vector<2x32xf32>
    %cst_30 = arith.constant 0.000000e+00 : f32
    %29 = vector.broadcast %cst_30 : f32 to vector<2x32xf32>
    %30 = vector.extract_strided_slice %26 {offsets = [0, 0], sizes = [2, 64], strides = [1, 1]} : vector<16x64xf32> to vector<2x64xf32>
    %31 = vector.extract_strided_slice %27 {offsets = [0, 0], sizes = [2, 32], strides = [1, 1]} : vector<16x32xf32> to vector<2x32xf32>
    %cst_31 = arith.constant dense<0.000000e+00> : vector<2x64xf32>
    %32 = tpu.matmul %28, %5, %cst_31 {dimension_numbers = #tpu.dot_dimension_numbers<[1], [0], [0], [1], [0, 0, 1, 1], [], []>} : vector<2x32xf32>, vector<32x64xf32>, vector<2x64xf32> -> vector<2x64xf32>
    %33 = vector.broadcast %7 : vector<1x64xf32> to vector<2x64xf32>
    %34 = arith.addf %32, %33 : vector<2x64xf32>
    %cst_32 = arith.constant dense<0.000000e+00> : vector<2x32xf32>
    %35 = tpu.matmul %28, %6, %cst_32 {dimension_numbers = #tpu.dot_dimension_numbers<[1], [0], [0], [1], [0, 0, 1, 1], [], []>} : vector<2x32xf32>, vector<32x32xf32>, vector<2x32xf32> -> vector<2x32xf32>
    %36 = vector.broadcast %8 : vector<1x32xf32> to vector<2x32xf32>
    %37 = arith.addf %35, %36 : vector<2x32xf32>
    %38 = arith.addf %30, %34 : vector<2x64xf32>
    %39 = arith.negf %38 : vector<2x64xf32>
    %40 = math.exp %39 : vector<2x64xf32>
    %cst_33 = arith.constant 1.000000e+00 : f32
    %41 = vector.broadcast %cst_33 : f32 to vector<2x64xf32>
    %42 = arith.addf %41, %40 : vector<2x64xf32>
    %43 = arith.divf %41, %42 : vector<2x64xf32>
    %44 = vector.extract_strided_slice %43 {offsets = [0, 0], sizes = [2, 32], strides = [1, 1]} : vector<2x64xf32> to vector<2x32xf32>
    %45 = vector.extract_strided_slice %43 {offsets = [0, 32], sizes = [2, 32], strides = [1, 1]} : vector<2x64xf32> to vector<2x32xf32>
    %46 = arith.mulf %44, %37 : vector<2x32xf32>
    %47 = arith.addf %31, %46 : vector<2x32xf32>
    %48 = math.tanh %47 : vector<2x32xf32>
    %cst_34 = arith.constant 1.000000e+00 : f32
    %49 = vector.broadcast %cst_34 : f32 to vector<2x32xf32>
    %50 = arith.subf %49, %45 : vector<2x32xf32>
    %51 = arith.mulf %50, %48 : vector<2x32xf32>
    %52 = arith.mulf %45, %28 : vector<2x32xf32>
    %53 = arith.addf %51, %52 : vector<2x32xf32>
    %54 = arith.addf %29, %53 : vector<2x32xf32>
    %55 = vector.extract_strided_slice %26 {offsets = [2, 0], sizes = [2, 64], strides = [1, 1]} : vector<16x64xf32> to vector<2x64xf32>
    %56 = vector.extract_strided_slice %27 {offsets = [2, 0], sizes = [2, 32], strides = [1, 1]} : vector<16x32xf32> to vector<2x32xf32>
    %cst_35 = arith.constant dense<0.000000e+00> : vector<2x64xf32>
    %57 = tpu.matmul %53, %5, %cst_35 {dimension_numbers = #tpu.dot_dimension_numbers<[1], [0], [0], [1], [0, 0, 1, 1], [], []>} : vector<2x32xf32>, vector<32x64xf32>, vector<2x64xf32> -> vector<2x64xf32>
    %58 = vector.broadcast %7 : vector<1x64xf32> to vector<2x64xf32>
    %59 = arith.addf %57, %58 : vector<2x64xf32>
    %cst_36 = arith.constant dense<0.000000e+00> : vector<2x32xf32>
    %60 = tpu.matmul %53, %6, %cst_36 {dimension_numbers = #tpu.dot_dimension_numbers<[1], [0], [0], [1], [0, 0, 1, 1], [], []>} : vector<2x32xf32>, vector<32x32xf32>, vector<2x32xf32> -> vector<2x32xf32>
    %61 = vector.broadcast %8 : vector<1x32xf32> to vector<2x32xf32>
    %62 = arith.addf %60, %61 : vector<2x32xf32>
    %63 = arith.addf %55, %59 : vector<2x64xf32>
    %64 = arith.negf %63 : vector<2x64xf32>
    %65 = math.exp %64 : vector<2x64xf32>
    %cst_37 = arith.constant 1.000000e+00 : f32
    %66 = vector.broadcast %cst_37 : f32 to vector<2x64xf32>
    %67 = arith.addf %66, %65 : vector<2x64xf32>
    %68 = arith.divf %66, %67 : vector<2x64xf32>
    %69 = vector.extract_strided_slice %68 {offsets = [0, 0], sizes = [2, 32], strides = [1, 1]} : vector<2x64xf32> to vector<2x32xf32>
    %70 = vector.extract_strided_slice %68 {offsets = [0, 32], sizes = [2, 32], strides = [1, 1]} : vector<2x64xf32> to vector<2x32xf32>
    %71 = arith.mulf %69, %62 : vector<2x32xf32>
    %72 = arith.addf %56, %71 : vector<2x32xf32>
    %73 = math.tanh %72 : vector<2x32xf32>
    %cst_38 = arith.constant 1.000000e+00 : f32
    %74 = vector.broadcast %cst_38 : f32 to vector<2x32xf32>
    %75 = arith.subf %74, %70 : vector<2x32xf32>
    %76 = arith.mulf %75, %73 : vector<2x32xf32>
    %77 = arith.mulf %70, %53 : vector<2x32xf32>
    %78 = arith.addf %76, %77 : vector<2x32xf32>
    %79 = arith.addf %54, %78 : vector<2x32xf32>
    %80 = vector.extract_strided_slice %26 {offsets = [4, 0], sizes = [2, 64], strides = [1, 1]} : vector<16x64xf32> to vector<2x64xf32>
    %81 = vector.extract_strided_slice %27 {offsets = [4, 0], sizes = [2, 32], strides = [1, 1]} : vector<16x32xf32> to vector<2x32xf32>
    %cst_39 = arith.constant dense<0.000000e+00> : vector<2x64xf32>
    %82 = tpu.matmul %78, %5, %cst_39 {dimension_numbers = #tpu.dot_dimension_numbers<[1], [0], [0], [1], [0, 0, 1, 1], [], []>} : vector<2x32xf32>, vector<32x64xf32>, vector<2x64xf32> -> vector<2x64xf32>
    %83 = vector.broadcast %7 : vector<1x64xf32> to vector<2x64xf32>
    %84 = arith.addf %82, %83 : vector<2x64xf32>
    %cst_40 = arith.constant dense<0.000000e+00> : vector<2x32xf32>
    %85 = tpu.matmul %78, %6, %cst_40 {dimension_numbers = #tpu.dot_dimension_numbers<[1], [0], [0], [1], [0, 0, 1, 1], [], []>} : vector<2x32xf32>, vector<32x32xf32>, vector<2x32xf32> -> vector<2x32xf32>
    %86 = vector.broadcast %8 : vector<1x32xf32> to vector<2x32xf32>
    %87 = arith.addf %85, %86 : vector<2x32xf32>
    %88 = arith.addf %80, %84 : vector<2x64xf32>
    %89 = arith.negf %88 : vector<2x64xf32>
    %90 = math.exp %89 : vector<2x64xf32>
    %cst_41 = arith.constant 1.000000e+00 : f32
    %91 = vector.broadcast %cst_41 : f32 to vector<2x64xf32>
    %92 = arith.addf %91, %90 : vector<2x64xf32>
    %93 = arith.divf %91, %92 : vector<2x64xf32>
    %94 = vector.extract_strided_slice %93 {offsets = [0, 0], sizes = [2, 32], strides = [1, 1]} : vector<2x64xf32> to vector<2x32xf32>
    %95 = vector.extract_strided_slice %93 {offsets = [0, 32], sizes = [2, 32], strides = [1, 1]} : vector<2x64xf32> to vector<2x32xf32>
    %96 = arith.mulf %94, %87 : vector<2x32xf32>
    %97 = arith.addf %81, %96 : vector<2x32xf32>
    %98 = math.tanh %97 : vector<2x32xf32>
    %cst_42 = arith.constant 1.000000e+00 : f32
    %99 = vector.broadcast %cst_42 : f32 to vector<2x32xf32>
    %100 = arith.subf %99, %95 : vector<2x32xf32>
    %101 = arith.mulf %100, %98 : vector<2x32xf32>
    %102 = arith.mulf %95, %78 : vector<2x32xf32>
    %103 = arith.addf %101, %102 : vector<2x32xf32>
    %104 = arith.addf %79, %103 : vector<2x32xf32>
    %105 = vector.extract_strided_slice %26 {offsets = [6, 0], sizes = [2, 64], strides = [1, 1]} : vector<16x64xf32> to vector<2x64xf32>
    %106 = vector.extract_strided_slice %27 {offsets = [6, 0], sizes = [2, 32], strides = [1, 1]} : vector<16x32xf32> to vector<2x32xf32>
    %cst_43 = arith.constant dense<0.000000e+00> : vector<2x64xf32>
    %107 = tpu.matmul %103, %5, %cst_43 {dimension_numbers = #tpu.dot_dimension_numbers<[1], [0], [0], [1], [0, 0, 1, 1], [], []>} : vector<2x32xf32>, vector<32x64xf32>, vector<2x64xf32> -> vector<2x64xf32>
    %108 = vector.broadcast %7 : vector<1x64xf32> to vector<2x64xf32>
    %109 = arith.addf %107, %108 : vector<2x64xf32>
    %cst_44 = arith.constant dense<0.000000e+00> : vector<2x32xf32>
    %110 = tpu.matmul %103, %6, %cst_44 {dimension_numbers = #tpu.dot_dimension_numbers<[1], [0], [0], [1], [0, 0, 1, 1], [], []>} : vector<2x32xf32>, vector<32x32xf32>, vector<2x32xf32> -> vector<2x32xf32>
    %111 = vector.broadcast %8 : vector<1x32xf32> to vector<2x32xf32>
    %112 = arith.addf %110, %111 : vector<2x32xf32>
    %113 = arith.addf %105, %109 : vector<2x64xf32>
    %114 = arith.negf %113 : vector<2x64xf32>
    %115 = math.exp %114 : vector<2x64xf32>
    %cst_45 = arith.constant 1.000000e+00 : f32
    %116 = vector.broadcast %cst_45 : f32 to vector<2x64xf32>
    %117 = arith.addf %116, %115 : vector<2x64xf32>
    %118 = arith.divf %116, %117 : vector<2x64xf32>
    %119 = vector.extract_strided_slice %118 {offsets = [0, 0], sizes = [2, 32], strides = [1, 1]} : vector<2x64xf32> to vector<2x32xf32>
    %120 = vector.extract_strided_slice %118 {offsets = [0, 32], sizes = [2, 32], strides = [1, 1]} : vector<2x64xf32> to vector<2x32xf32>
    %121 = arith.mulf %119, %112 : vector<2x32xf32>
    %122 = arith.addf %106, %121 : vector<2x32xf32>
    %123 = math.tanh %122 : vector<2x32xf32>
    %cst_46 = arith.constant 1.000000e+00 : f32
    %124 = vector.broadcast %cst_46 : f32 to vector<2x32xf32>
    %125 = arith.subf %124, %120 : vector<2x32xf32>
    %126 = arith.mulf %125, %123 : vector<2x32xf32>
    %127 = arith.mulf %120, %103 : vector<2x32xf32>
    %128 = arith.addf %126, %127 : vector<2x32xf32>
    %129 = arith.addf %104, %128 : vector<2x32xf32>
    %130 = vector.extract_strided_slice %26 {offsets = [8, 0], sizes = [2, 64], strides = [1, 1]} : vector<16x64xf32> to vector<2x64xf32>
    %131 = vector.extract_strided_slice %27 {offsets = [8, 0], sizes = [2, 32], strides = [1, 1]} : vector<16x32xf32> to vector<2x32xf32>
    %cst_47 = arith.constant dense<0.000000e+00> : vector<2x64xf32>
    %132 = tpu.matmul %128, %5, %cst_47 {dimension_numbers = #tpu.dot_dimension_numbers<[1], [0], [0], [1], [0, 0, 1, 1], [], []>} : vector<2x32xf32>, vector<32x64xf32>, vector<2x64xf32> -> vector<2x64xf32>
    %133 = vector.broadcast %7 : vector<1x64xf32> to vector<2x64xf32>
    %134 = arith.addf %132, %133 : vector<2x64xf32>
    %cst_48 = arith.constant dense<0.000000e+00> : vector<2x32xf32>
    %135 = tpu.matmul %128, %6, %cst_48 {dimension_numbers = #tpu.dot_dimension_numbers<[1], [0], [0], [1], [0, 0, 1, 1], [], []>} : vector<2x32xf32>, vector<32x32xf32>, vector<2x32xf32> -> vector<2x32xf32>
    %136 = vector.broadcast %8 : vector<1x32xf32> to vector<2x32xf32>
    %137 = arith.addf %135, %136 : vector<2x32xf32>
    %138 = arith.addf %130, %134 : vector<2x64xf32>
    %139 = arith.negf %138 : vector<2x64xf32>
    %140 = math.exp %139 : vector<2x64xf32>
    %cst_49 = arith.constant 1.000000e+00 : f32
    %141 = vector.broadcast %cst_49 : f32 to vector<2x64xf32>
    %142 = arith.addf %141, %140 : vector<2x64xf32>
    %143 = arith.divf %141, %142 : vector<2x64xf32>
    %144 = vector.extract_strided_slice %143 {offsets = [0, 0], sizes = [2, 32], strides = [1, 1]} : vector<2x64xf32> to vector<2x32xf32>
    %145 = vector.extract_strided_slice %143 {offsets = [0, 32], sizes = [2, 32], strides = [1, 1]} : vector<2x64xf32> to vector<2x32xf32>
    %146 = arith.mulf %144, %137 : vector<2x32xf32>
    %147 = arith.addf %131, %146 : vector<2x32xf32>
    %148 = math.tanh %147 : vector<2x32xf32>
    %cst_50 = arith.constant 1.000000e+00 : f32
    %149 = vector.broadcast %cst_50 : f32 to vector<2x32xf32>
    %150 = arith.subf %149, %145 : vector<2x32xf32>
    %151 = arith.mulf %150, %148 : vector<2x32xf32>
    %152 = arith.mulf %145, %128 : vector<2x32xf32>
    %153 = arith.addf %151, %152 : vector<2x32xf32>
    %154 = arith.addf %129, %153 : vector<2x32xf32>
    %155 = vector.extract_strided_slice %26 {offsets = [10, 0], sizes = [2, 64], strides = [1, 1]} : vector<16x64xf32> to vector<2x64xf32>
    %156 = vector.extract_strided_slice %27 {offsets = [10, 0], sizes = [2, 32], strides = [1, 1]} : vector<16x32xf32> to vector<2x32xf32>
    %cst_51 = arith.constant dense<0.000000e+00> : vector<2x64xf32>
    %157 = tpu.matmul %153, %5, %cst_51 {dimension_numbers = #tpu.dot_dimension_numbers<[1], [0], [0], [1], [0, 0, 1, 1], [], []>} : vector<2x32xf32>, vector<32x64xf32>, vector<2x64xf32> -> vector<2x64xf32>
    %158 = vector.broadcast %7 : vector<1x64xf32> to vector<2x64xf32>
    %159 = arith.addf %157, %158 : vector<2x64xf32>
    %cst_52 = arith.constant dense<0.000000e+00> : vector<2x32xf32>
    %160 = tpu.matmul %153, %6, %cst_52 {dimension_numbers = #tpu.dot_dimension_numbers<[1], [0], [0], [1], [0, 0, 1, 1], [], []>} : vector<2x32xf32>, vector<32x32xf32>, vector<2x32xf32> -> vector<2x32xf32>
    %161 = vector.broadcast %8 : vector<1x32xf32> to vector<2x32xf32>
    %162 = arith.addf %160, %161 : vector<2x32xf32>
    %163 = arith.addf %155, %159 : vector<2x64xf32>
    %164 = arith.negf %163 : vector<2x64xf32>
    %165 = math.exp %164 : vector<2x64xf32>
    %cst_53 = arith.constant 1.000000e+00 : f32
    %166 = vector.broadcast %cst_53 : f32 to vector<2x64xf32>
    %167 = arith.addf %166, %165 : vector<2x64xf32>
    %168 = arith.divf %166, %167 : vector<2x64xf32>
    %169 = vector.extract_strided_slice %168 {offsets = [0, 0], sizes = [2, 32], strides = [1, 1]} : vector<2x64xf32> to vector<2x32xf32>
    %170 = vector.extract_strided_slice %168 {offsets = [0, 32], sizes = [2, 32], strides = [1, 1]} : vector<2x64xf32> to vector<2x32xf32>
    %171 = arith.mulf %169, %162 : vector<2x32xf32>
    %172 = arith.addf %156, %171 : vector<2x32xf32>
    %173 = math.tanh %172 : vector<2x32xf32>
    %cst_54 = arith.constant 1.000000e+00 : f32
    %174 = vector.broadcast %cst_54 : f32 to vector<2x32xf32>
    %175 = arith.subf %174, %170 : vector<2x32xf32>
    %176 = arith.mulf %175, %173 : vector<2x32xf32>
    %177 = arith.mulf %170, %153 : vector<2x32xf32>
    %178 = arith.addf %176, %177 : vector<2x32xf32>
    %179 = arith.addf %154, %178 : vector<2x32xf32>
    %180 = vector.extract_strided_slice %26 {offsets = [12, 0], sizes = [2, 64], strides = [1, 1]} : vector<16x64xf32> to vector<2x64xf32>
    %181 = vector.extract_strided_slice %27 {offsets = [12, 0], sizes = [2, 32], strides = [1, 1]} : vector<16x32xf32> to vector<2x32xf32>
    %cst_55 = arith.constant dense<0.000000e+00> : vector<2x64xf32>
    %182 = tpu.matmul %178, %5, %cst_55 {dimension_numbers = #tpu.dot_dimension_numbers<[1], [0], [0], [1], [0, 0, 1, 1], [], []>} : vector<2x32xf32>, vector<32x64xf32>, vector<2x64xf32> -> vector<2x64xf32>
    %183 = vector.broadcast %7 : vector<1x64xf32> to vector<2x64xf32>
    %184 = arith.addf %182, %183 : vector<2x64xf32>
    %cst_56 = arith.constant dense<0.000000e+00> : vector<2x32xf32>
    %185 = tpu.matmul %178, %6, %cst_56 {dimension_numbers = #tpu.dot_dimension_numbers<[1], [0], [0], [1], [0, 0, 1, 1], [], []>} : vector<2x32xf32>, vector<32x32xf32>, vector<2x32xf32> -> vector<2x32xf32>
    %186 = vector.broadcast %8 : vector<1x32xf32> to vector<2x32xf32>
    %187 = arith.addf %185, %186 : vector<2x32xf32>
    %188 = arith.addf %180, %184 : vector<2x64xf32>
    %189 = arith.negf %188 : vector<2x64xf32>
    %190 = math.exp %189 : vector<2x64xf32>
    %cst_57 = arith.constant 1.000000e+00 : f32
    %191 = vector.broadcast %cst_57 : f32 to vector<2x64xf32>
    %192 = arith.addf %191, %190 : vector<2x64xf32>
    %193 = arith.divf %191, %192 : vector<2x64xf32>
    %194 = vector.extract_strided_slice %193 {offsets = [0, 0], sizes = [2, 32], strides = [1, 1]} : vector<2x64xf32> to vector<2x32xf32>
    %195 = vector.extract_strided_slice %193 {offsets = [0, 32], sizes = [2, 32], strides = [1, 1]} : vector<2x64xf32> to vector<2x32xf32>
    %196 = arith.mulf %194, %187 : vector<2x32xf32>
    %197 = arith.addf %181, %196 : vector<2x32xf32>
    %198 = math.tanh %197 : vector<2x32xf32>
    %cst_58 = arith.constant 1.000000e+00 : f32
    %199 = vector.broadcast %cst_58 : f32 to vector<2x32xf32>
    %200 = arith.subf %199, %195 : vector<2x32xf32>
    %201 = arith.mulf %200, %198 : vector<2x32xf32>
    %202 = arith.mulf %195, %178 : vector<2x32xf32>
    %203 = arith.addf %201, %202 : vector<2x32xf32>
    %204 = arith.addf %179, %203 : vector<2x32xf32>
    %205 = vector.extract_strided_slice %26 {offsets = [14, 0], sizes = [2, 64], strides = [1, 1]} : vector<16x64xf32> to vector<2x64xf32>
    %206 = vector.extract_strided_slice %27 {offsets = [14, 0], sizes = [2, 32], strides = [1, 1]} : vector<16x32xf32> to vector<2x32xf32>
    %cst_59 = arith.constant dense<0.000000e+00> : vector<2x64xf32>
    %207 = tpu.matmul %203, %5, %cst_59 {dimension_numbers = #tpu.dot_dimension_numbers<[1], [0], [0], [1], [0, 0, 1, 1], [], []>} : vector<2x32xf32>, vector<32x64xf32>, vector<2x64xf32> -> vector<2x64xf32>
    %208 = vector.broadcast %7 : vector<1x64xf32> to vector<2x64xf32>
    %209 = arith.addf %207, %208 : vector<2x64xf32>
    %cst_60 = arith.constant dense<0.000000e+00> : vector<2x32xf32>
    %210 = tpu.matmul %203, %6, %cst_60 {dimension_numbers = #tpu.dot_dimension_numbers<[1], [0], [0], [1], [0, 0, 1, 1], [], []>} : vector<2x32xf32>, vector<32x32xf32>, vector<2x32xf32> -> vector<2x32xf32>
    %211 = vector.broadcast %8 : vector<1x32xf32> to vector<2x32xf32>
    %212 = arith.addf %210, %211 : vector<2x32xf32>
    %213 = arith.addf %205, %209 : vector<2x64xf32>
    %214 = arith.negf %213 : vector<2x64xf32>
    %215 = math.exp %214 : vector<2x64xf32>
    %cst_61 = arith.constant 1.000000e+00 : f32
    %216 = vector.broadcast %cst_61 : f32 to vector<2x64xf32>
    %217 = arith.addf %216, %215 : vector<2x64xf32>
    %218 = arith.divf %216, %217 : vector<2x64xf32>
    %219 = vector.extract_strided_slice %218 {offsets = [0, 0], sizes = [2, 32], strides = [1, 1]} : vector<2x64xf32> to vector<2x32xf32>
    %220 = vector.extract_strided_slice %218 {offsets = [0, 32], sizes = [2, 32], strides = [1, 1]} : vector<2x64xf32> to vector<2x32xf32>
    %221 = arith.mulf %219, %212 : vector<2x32xf32>
    %222 = arith.addf %206, %221 : vector<2x32xf32>
    %223 = math.tanh %222 : vector<2x32xf32>
    %cst_62 = arith.constant 1.000000e+00 : f32
    %224 = vector.broadcast %cst_62 : f32 to vector<2x32xf32>
    %225 = arith.subf %224, %220 : vector<2x32xf32>
    %226 = arith.mulf %225, %223 : vector<2x32xf32>
    %227 = arith.mulf %220, %203 : vector<2x32xf32>
    %228 = arith.addf %226, %227 : vector<2x32xf32>
    %229 = arith.addf %204, %228 : vector<2x32xf32>
    %cst_63 = arith.constant 1.250000e-01 : f32
    %230 = vector.broadcast %cst_63 : f32 to vector<2x32xf32>
    %231 = arith.mulf %229, %230 : vector<2x32xf32>
    %cst_64 = arith.constant dense<0.000000e+00> : vector<2x32xf32>
    %232 = tpu.matmul %231, %17, %cst_64 {dimension_numbers = #tpu.dot_dimension_numbers<[1], [0], [0], [1], [0, 0, 1, 1], [], []>} : vector<2x32xf32>, vector<32x32xf32>, vector<2x32xf32> -> vector<2x32xf32>
    %233 = vector.broadcast %18 : vector<1x32xf32> to vector<2x32xf32>
    %234 = arith.addf %232, %233 : vector<2x32xf32>
    %cst_65 = arith.constant dense<0.000000e+00> : vector<2x32xf32>
    %235 = tpu.matmul %231, %19, %cst_65 {dimension_numbers = #tpu.dot_dimension_numbers<[1], [0], [0], [1], [0, 0, 1, 1], [], []>} : vector<2x32xf32>, vector<32x32xf32>, vector<2x32xf32> -> vector<2x32xf32>
    %236 = vector.broadcast %20 : vector<1x32xf32> to vector<2x32xf32>
    %237 = arith.addf %235, %236 : vector<2x32xf32>
    %238 = tpu.concatenate %234, %234, %234, %234, %234, %234, %234, %234 in 0 : vector<2x32xf32>, vector<2x32xf32>, vector<2x32xf32>, vector<2x32xf32>, vector<2x32xf32>, vector<2x32xf32>, vector<2x32xf32>, vector<2x32xf32> -> vector<16x32xf32>
    %239 = tpu.concatenate %237, %237, %237, %237, %237, %237, %237, %237 in 0 : vector<2x32xf32>, vector<2x32xf32>, vector<2x32xf32>, vector<2x32xf32>, vector<2x32xf32>, vector<2x32xf32>, vector<2x32xf32>, vector<2x32xf32> -> vector<16x32xf32>
    %240 = arith.mulf %238, %0 : vector<16x32xf32>
    %241 = arith.addf %240, %239 : vector<16x32xf32>
    %cst_66 = arith.constant dense<0.000000e+00> : vector<16x96xf32>
    %242 = tpu.matmul %241, %9, %cst_66 {dimension_numbers = #tpu.dot_dimension_numbers<[1], [0], [0], [1], [0, 0, 1, 1], [], []>} : vector<16x32xf32>, vector<32x96xf32>, vector<16x96xf32> -> vector<16x96xf32>
    %243 = vector.broadcast %11 : vector<1x96xf32> to vector<16x96xf32>
    %244 = arith.addf %242, %243 : vector<16x96xf32>
    %245 = vector.extract_strided_slice %244 {offsets = [0, 0], sizes = [16, 64], strides = [1, 1]} : vector<16x96xf32> to vector<16x64xf32>
    %246 = vector.extract_strided_slice %244 {offsets = [0, 64], sizes = [16, 32], strides = [1, 1]} : vector<16x96xf32> to vector<16x32xf32>
    %cst_67 = arith.constant 0.000000e+00 : f32
    %247 = vector.broadcast %cst_67 : f32 to vector<2x32xf32>
    %248 = vector.extract_strided_slice %245 {offsets = [0, 0], sizes = [2, 64], strides = [1, 1]} : vector<16x64xf32> to vector<2x64xf32>
    %249 = vector.extract_strided_slice %246 {offsets = [0, 0], sizes = [2, 32], strides = [1, 1]} : vector<16x32xf32> to vector<2x32xf32>
    %cst_68 = arith.constant dense<0.000000e+00> : vector<2x64xf32>
    %250 = tpu.matmul %247, %13, %cst_68 {dimension_numbers = #tpu.dot_dimension_numbers<[1], [0], [0], [1], [0, 0, 1, 1], [], []>} : vector<2x32xf32>, vector<32x64xf32>, vector<2x64xf32> -> vector<2x64xf32>
    %251 = vector.broadcast %15 : vector<1x64xf32> to vector<2x64xf32>
    %252 = arith.addf %250, %251 : vector<2x64xf32>
    %cst_69 = arith.constant dense<0.000000e+00> : vector<2x32xf32>
    %253 = tpu.matmul %247, %14, %cst_69 {dimension_numbers = #tpu.dot_dimension_numbers<[1], [0], [0], [1], [0, 0, 1, 1], [], []>} : vector<2x32xf32>, vector<32x32xf32>, vector<2x32xf32> -> vector<2x32xf32>
    %254 = vector.broadcast %16 : vector<1x32xf32> to vector<2x32xf32>
    %255 = arith.addf %253, %254 : vector<2x32xf32>
    %256 = arith.addf %248, %252 : vector<2x64xf32>
    %257 = arith.negf %256 : vector<2x64xf32>
    %258 = math.exp %257 : vector<2x64xf32>
    %cst_70 = arith.constant 1.000000e+00 : f32
    %259 = vector.broadcast %cst_70 : f32 to vector<2x64xf32>
    %260 = arith.addf %259, %258 : vector<2x64xf32>
    %261 = arith.divf %259, %260 : vector<2x64xf32>
    %262 = vector.extract_strided_slice %261 {offsets = [0, 0], sizes = [2, 32], strides = [1, 1]} : vector<2x64xf32> to vector<2x32xf32>
    %263 = vector.extract_strided_slice %261 {offsets = [0, 32], sizes = [2, 32], strides = [1, 1]} : vector<2x64xf32> to vector<2x32xf32>
    %264 = arith.mulf %262, %255 : vector<2x32xf32>
    %265 = arith.addf %249, %264 : vector<2x32xf32>
    %266 = math.tanh %265 : vector<2x32xf32>
    %cst_71 = arith.constant 1.000000e+00 : f32
    %267 = vector.broadcast %cst_71 : f32 to vector<2x32xf32>
    %268 = arith.subf %267, %263 : vector<2x32xf32>
    %269 = arith.mulf %268, %266 : vector<2x32xf32>
    %270 = arith.mulf %263, %247 : vector<2x32xf32>
    %271 = arith.addf %269, %270 : vector<2x32xf32>
    %272 = vector.extract_strided_slice %245 {offsets = [2, 0], sizes = [2, 64], strides = [1, 1]} : vector<16x64xf32> to vector<2x64xf32>
    %273 = vector.extract_strided_slice %246 {offsets = [2, 0], sizes = [2, 32], strides = [1, 1]} : vector<16x32xf32> to vector<2x32xf32>
    %cst_72 = arith.constant dense<0.000000e+00> : vector<2x64xf32>
    %274 = tpu.matmul %271, %13, %cst_72 {dimension_numbers = #tpu.dot_dimension_numbers<[1], [0], [0], [1], [0, 0, 1, 1], [], []>} : vector<2x32xf32>, vector<32x64xf32>, vector<2x64xf32> -> vector<2x64xf32>
    %275 = vector.broadcast %15 : vector<1x64xf32> to vector<2x64xf32>
    %276 = arith.addf %274, %275 : vector<2x64xf32>
    %cst_73 = arith.constant dense<0.000000e+00> : vector<2x32xf32>
    %277 = tpu.matmul %271, %14, %cst_73 {dimension_numbers = #tpu.dot_dimension_numbers<[1], [0], [0], [1], [0, 0, 1, 1], [], []>} : vector<2x32xf32>, vector<32x32xf32>, vector<2x32xf32> -> vector<2x32xf32>
    %278 = vector.broadcast %16 : vector<1x32xf32> to vector<2x32xf32>
    %279 = arith.addf %277, %278 : vector<2x32xf32>
    %280 = arith.addf %272, %276 : vector<2x64xf32>
    %281 = arith.negf %280 : vector<2x64xf32>
    %282 = math.exp %281 : vector<2x64xf32>
    %cst_74 = arith.constant 1.000000e+00 : f32
    %283 = vector.broadcast %cst_74 : f32 to vector<2x64xf32>
    %284 = arith.addf %283, %282 : vector<2x64xf32>
    %285 = arith.divf %283, %284 : vector<2x64xf32>
    %286 = vector.extract_strided_slice %285 {offsets = [0, 0], sizes = [2, 32], strides = [1, 1]} : vector<2x64xf32> to vector<2x32xf32>
    %287 = vector.extract_strided_slice %285 {offsets = [0, 32], sizes = [2, 32], strides = [1, 1]} : vector<2x64xf32> to vector<2x32xf32>
    %288 = arith.mulf %286, %279 : vector<2x32xf32>
    %289 = arith.addf %273, %288 : vector<2x32xf32>
    %290 = math.tanh %289 : vector<2x32xf32>
    %cst_75 = arith.constant 1.000000e+00 : f32
    %291 = vector.broadcast %cst_75 : f32 to vector<2x32xf32>
    %292 = arith.subf %291, %287 : vector<2x32xf32>
    %293 = arith.mulf %292, %290 : vector<2x32xf32>
    %294 = arith.mulf %287, %271 : vector<2x32xf32>
    %295 = arith.addf %293, %294 : vector<2x32xf32>
    %296 = vector.extract_strided_slice %245 {offsets = [4, 0], sizes = [2, 64], strides = [1, 1]} : vector<16x64xf32> to vector<2x64xf32>
    %297 = vector.extract_strided_slice %246 {offsets = [4, 0], sizes = [2, 32], strides = [1, 1]} : vector<16x32xf32> to vector<2x32xf32>
    %cst_76 = arith.constant dense<0.000000e+00> : vector<2x64xf32>
    %298 = tpu.matmul %295, %13, %cst_76 {dimension_numbers = #tpu.dot_dimension_numbers<[1], [0], [0], [1], [0, 0, 1, 1], [], []>} : vector<2x32xf32>, vector<32x64xf32>, vector<2x64xf32> -> vector<2x64xf32>
    %299 = vector.broadcast %15 : vector<1x64xf32> to vector<2x64xf32>
    %300 = arith.addf %298, %299 : vector<2x64xf32>
    %cst_77 = arith.constant dense<0.000000e+00> : vector<2x32xf32>
    %301 = tpu.matmul %295, %14, %cst_77 {dimension_numbers = #tpu.dot_dimension_numbers<[1], [0], [0], [1], [0, 0, 1, 1], [], []>} : vector<2x32xf32>, vector<32x32xf32>, vector<2x32xf32> -> vector<2x32xf32>
    %302 = vector.broadcast %16 : vector<1x32xf32> to vector<2x32xf32>
    %303 = arith.addf %301, %302 : vector<2x32xf32>
    %304 = arith.addf %296, %300 : vector<2x64xf32>
    %305 = arith.negf %304 : vector<2x64xf32>
    %306 = math.exp %305 : vector<2x64xf32>
    %cst_78 = arith.constant 1.000000e+00 : f32
    %307 = vector.broadcast %cst_78 : f32 to vector<2x64xf32>
    %308 = arith.addf %307, %306 : vector<2x64xf32>
    %309 = arith.divf %307, %308 : vector<2x64xf32>
    %310 = vector.extract_strided_slice %309 {offsets = [0, 0], sizes = [2, 32], strides = [1, 1]} : vector<2x64xf32> to vector<2x32xf32>
    %311 = vector.extract_strided_slice %309 {offsets = [0, 32], sizes = [2, 32], strides = [1, 1]} : vector<2x64xf32> to vector<2x32xf32>
    %312 = arith.mulf %310, %303 : vector<2x32xf32>
    %313 = arith.addf %297, %312 : vector<2x32xf32>
    %314 = math.tanh %313 : vector<2x32xf32>
    %cst_79 = arith.constant 1.000000e+00 : f32
    %315 = vector.broadcast %cst_79 : f32 to vector<2x32xf32>
    %316 = arith.subf %315, %311 : vector<2x32xf32>
    %317 = arith.mulf %316, %314 : vector<2x32xf32>
    %318 = arith.mulf %311, %295 : vector<2x32xf32>
    %319 = arith.addf %317, %318 : vector<2x32xf32>
    %320 = vector.extract_strided_slice %245 {offsets = [6, 0], sizes = [2, 64], strides = [1, 1]} : vector<16x64xf32> to vector<2x64xf32>
    %321 = vector.extract_strided_slice %246 {offsets = [6, 0], sizes = [2, 32], strides = [1, 1]} : vector<16x32xf32> to vector<2x32xf32>
    %cst_80 = arith.constant dense<0.000000e+00> : vector<2x64xf32>
    %322 = tpu.matmul %319, %13, %cst_80 {dimension_numbers = #tpu.dot_dimension_numbers<[1], [0], [0], [1], [0, 0, 1, 1], [], []>} : vector<2x32xf32>, vector<32x64xf32>, vector<2x64xf32> -> vector<2x64xf32>
    %323 = vector.broadcast %15 : vector<1x64xf32> to vector<2x64xf32>
    %324 = arith.addf %322, %323 : vector<2x64xf32>
    %cst_81 = arith.constant dense<0.000000e+00> : vector<2x32xf32>
    %325 = tpu.matmul %319, %14, %cst_81 {dimension_numbers = #tpu.dot_dimension_numbers<[1], [0], [0], [1], [0, 0, 1, 1], [], []>} : vector<2x32xf32>, vector<32x32xf32>, vector<2x32xf32> -> vector<2x32xf32>
    %326 = vector.broadcast %16 : vector<1x32xf32> to vector<2x32xf32>
    %327 = arith.addf %325, %326 : vector<2x32xf32>
    %328 = arith.addf %320, %324 : vector<2x64xf32>
    %329 = arith.negf %328 : vector<2x64xf32>
    %330 = math.exp %329 : vector<2x64xf32>
    %cst_82 = arith.constant 1.000000e+00 : f32
    %331 = vector.broadcast %cst_82 : f32 to vector<2x64xf32>
    %332 = arith.addf %331, %330 : vector<2x64xf32>
    %333 = arith.divf %331, %332 : vector<2x64xf32>
    %334 = vector.extract_strided_slice %333 {offsets = [0, 0], sizes = [2, 32], strides = [1, 1]} : vector<2x64xf32> to vector<2x32xf32>
    %335 = vector.extract_strided_slice %333 {offsets = [0, 32], sizes = [2, 32], strides = [1, 1]} : vector<2x64xf32> to vector<2x32xf32>
    %336 = arith.mulf %334, %327 : vector<2x32xf32>
    %337 = arith.addf %321, %336 : vector<2x32xf32>
    %338 = math.tanh %337 : vector<2x32xf32>
    %cst_83 = arith.constant 1.000000e+00 : f32
    %339 = vector.broadcast %cst_83 : f32 to vector<2x32xf32>
    %340 = arith.subf %339, %335 : vector<2x32xf32>
    %341 = arith.mulf %340, %338 : vector<2x32xf32>
    %342 = arith.mulf %335, %319 : vector<2x32xf32>
    %343 = arith.addf %341, %342 : vector<2x32xf32>
    %344 = vector.extract_strided_slice %245 {offsets = [8, 0], sizes = [2, 64], strides = [1, 1]} : vector<16x64xf32> to vector<2x64xf32>
    %345 = vector.extract_strided_slice %246 {offsets = [8, 0], sizes = [2, 32], strides = [1, 1]} : vector<16x32xf32> to vector<2x32xf32>
    %cst_84 = arith.constant dense<0.000000e+00> : vector<2x64xf32>
    %346 = tpu.matmul %343, %13, %cst_84 {dimension_numbers = #tpu.dot_dimension_numbers<[1], [0], [0], [1], [0, 0, 1, 1], [], []>} : vector<2x32xf32>, vector<32x64xf32>, vector<2x64xf32> -> vector<2x64xf32>
    %347 = vector.broadcast %15 : vector<1x64xf32> to vector<2x64xf32>
    %348 = arith.addf %346, %347 : vector<2x64xf32>
    %cst_85 = arith.constant dense<0.000000e+00> : vector<2x32xf32>
    %349 = tpu.matmul %343, %14, %cst_85 {dimension_numbers = #tpu.dot_dimension_numbers<[1], [0], [0], [1], [0, 0, 1, 1], [], []>} : vector<2x32xf32>, vector<32x32xf32>, vector<2x32xf32> -> vector<2x32xf32>
    %350 = vector.broadcast %16 : vector<1x32xf32> to vector<2x32xf32>
    %351 = arith.addf %349, %350 : vector<2x32xf32>
    %352 = arith.addf %344, %348 : vector<2x64xf32>
    %353 = arith.negf %352 : vector<2x64xf32>
    %354 = math.exp %353 : vector<2x64xf32>
    %cst_86 = arith.constant 1.000000e+00 : f32
    %355 = vector.broadcast %cst_86 : f32 to vector<2x64xf32>
    %356 = arith.addf %355, %354 : vector<2x64xf32>
    %357 = arith.divf %355, %356 : vector<2x64xf32>
    %358 = vector.extract_strided_slice %357 {offsets = [0, 0], sizes = [2, 32], strides = [1, 1]} : vector<2x64xf32> to vector<2x32xf32>
    %359 = vector.extract_strided_slice %357 {offsets = [0, 32], sizes = [2, 32], strides = [1, 1]} : vector<2x64xf32> to vector<2x32xf32>
    %360 = arith.mulf %358, %351 : vector<2x32xf32>
    %361 = arith.addf %345, %360 : vector<2x32xf32>
    %362 = math.tanh %361 : vector<2x32xf32>
    %cst_87 = arith.constant 1.000000e+00 : f32
    %363 = vector.broadcast %cst_87 : f32 to vector<2x32xf32>
    %364 = arith.subf %363, %359 : vector<2x32xf32>
    %365 = arith.mulf %364, %362 : vector<2x32xf32>
    %366 = arith.mulf %359, %343 : vector<2x32xf32>
    %367 = arith.addf %365, %366 : vector<2x32xf32>
    %368 = vector.extract_strided_slice %245 {offsets = [10, 0], sizes = [2, 64], strides = [1, 1]} : vector<16x64xf32> to vector<2x64xf32>
    %369 = vector.extract_strided_slice %246 {offsets = [10, 0], sizes = [2, 32], strides = [1, 1]} : vector<16x32xf32> to vector<2x32xf32>
    %cst_88 = arith.constant dense<0.000000e+00> : vector<2x64xf32>
    %370 = tpu.matmul %367, %13, %cst_88 {dimension_numbers = #tpu.dot_dimension_numbers<[1], [0], [0], [1], [0, 0, 1, 1], [], []>} : vector<2x32xf32>, vector<32x64xf32>, vector<2x64xf32> -> vector<2x64xf32>
    %371 = vector.broadcast %15 : vector<1x64xf32> to vector<2x64xf32>
    %372 = arith.addf %370, %371 : vector<2x64xf32>
    %cst_89 = arith.constant dense<0.000000e+00> : vector<2x32xf32>
    %373 = tpu.matmul %367, %14, %cst_89 {dimension_numbers = #tpu.dot_dimension_numbers<[1], [0], [0], [1], [0, 0, 1, 1], [], []>} : vector<2x32xf32>, vector<32x32xf32>, vector<2x32xf32> -> vector<2x32xf32>
    %374 = vector.broadcast %16 : vector<1x32xf32> to vector<2x32xf32>
    %375 = arith.addf %373, %374 : vector<2x32xf32>
    %376 = arith.addf %368, %372 : vector<2x64xf32>
    %377 = arith.negf %376 : vector<2x64xf32>
    %378 = math.exp %377 : vector<2x64xf32>
    %cst_90 = arith.constant 1.000000e+00 : f32
    %379 = vector.broadcast %cst_90 : f32 to vector<2x64xf32>
    %380 = arith.addf %379, %378 : vector<2x64xf32>
    %381 = arith.divf %379, %380 : vector<2x64xf32>
    %382 = vector.extract_strided_slice %381 {offsets = [0, 0], sizes = [2, 32], strides = [1, 1]} : vector<2x64xf32> to vector<2x32xf32>
    %383 = vector.extract_strided_slice %381 {offsets = [0, 32], sizes = [2, 32], strides = [1, 1]} : vector<2x64xf32> to vector<2x32xf32>
    %384 = arith.mulf %382, %375 : vector<2x32xf32>
    %385 = arith.addf %369, %384 : vector<2x32xf32>
    %386 = math.tanh %385 : vector<2x32xf32>
    %cst_91 = arith.constant 1.000000e+00 : f32
    %387 = vector.broadcast %cst_91 : f32 to vector<2x32xf32>
    %388 = arith.subf %387, %383 : vector<2x32xf32>
    %389 = arith.mulf %388, %386 : vector<2x32xf32>
    %390 = arith.mulf %383, %367 : vector<2x32xf32>
    %391 = arith.addf %389, %390 : vector<2x32xf32>
    %392 = vector.extract_strided_slice %245 {offsets = [12, 0], sizes = [2, 64], strides = [1, 1]} : vector<16x64xf32> to vector<2x64xf32>
    %393 = vector.extract_strided_slice %246 {offsets = [12, 0], sizes = [2, 32], strides = [1, 1]} : vector<16x32xf32> to vector<2x32xf32>
    %cst_92 = arith.constant dense<0.000000e+00> : vector<2x64xf32>
    %394 = tpu.matmul %391, %13, %cst_92 {dimension_numbers = #tpu.dot_dimension_numbers<[1], [0], [0], [1], [0, 0, 1, 1], [], []>} : vector<2x32xf32>, vector<32x64xf32>, vector<2x64xf32> -> vector<2x64xf32>
    %395 = vector.broadcast %15 : vector<1x64xf32> to vector<2x64xf32>
    %396 = arith.addf %394, %395 : vector<2x64xf32>
    %cst_93 = arith.constant dense<0.000000e+00> : vector<2x32xf32>
    %397 = tpu.matmul %391, %14, %cst_93 {dimension_numbers = #tpu.dot_dimension_numbers<[1], [0], [0], [1], [0, 0, 1, 1], [], []>} : vector<2x32xf32>, vector<32x32xf32>, vector<2x32xf32> -> vector<2x32xf32>
    %398 = vector.broadcast %16 : vector<1x32xf32> to vector<2x32xf32>
    %399 = arith.addf %397, %398 : vector<2x32xf32>
    %400 = arith.addf %392, %396 : vector<2x64xf32>
    %401 = arith.negf %400 : vector<2x64xf32>
    %402 = math.exp %401 : vector<2x64xf32>
    %cst_94 = arith.constant 1.000000e+00 : f32
    %403 = vector.broadcast %cst_94 : f32 to vector<2x64xf32>
    %404 = arith.addf %403, %402 : vector<2x64xf32>
    %405 = arith.divf %403, %404 : vector<2x64xf32>
    %406 = vector.extract_strided_slice %405 {offsets = [0, 0], sizes = [2, 32], strides = [1, 1]} : vector<2x64xf32> to vector<2x32xf32>
    %407 = vector.extract_strided_slice %405 {offsets = [0, 32], sizes = [2, 32], strides = [1, 1]} : vector<2x64xf32> to vector<2x32xf32>
    %408 = arith.mulf %406, %399 : vector<2x32xf32>
    %409 = arith.addf %393, %408 : vector<2x32xf32>
    %410 = math.tanh %409 : vector<2x32xf32>
    %cst_95 = arith.constant 1.000000e+00 : f32
    %411 = vector.broadcast %cst_95 : f32 to vector<2x32xf32>
    %412 = arith.subf %411, %407 : vector<2x32xf32>
    %413 = arith.mulf %412, %410 : vector<2x32xf32>
    %414 = arith.mulf %407, %391 : vector<2x32xf32>
    %415 = arith.addf %413, %414 : vector<2x32xf32>
    %416 = vector.extract_strided_slice %245 {offsets = [14, 0], sizes = [2, 64], strides = [1, 1]} : vector<16x64xf32> to vector<2x64xf32>
    %417 = vector.extract_strided_slice %246 {offsets = [14, 0], sizes = [2, 32], strides = [1, 1]} : vector<16x32xf32> to vector<2x32xf32>
    %cst_96 = arith.constant dense<0.000000e+00> : vector<2x64xf32>
    %418 = tpu.matmul %415, %13, %cst_96 {dimension_numbers = #tpu.dot_dimension_numbers<[1], [0], [0], [1], [0, 0, 1, 1], [], []>} : vector<2x32xf32>, vector<32x64xf32>, vector<2x64xf32> -> vector<2x64xf32>
    %419 = vector.broadcast %15 : vector<1x64xf32> to vector<2x64xf32>
    %420 = arith.addf %418, %419 : vector<2x64xf32>
    %cst_97 = arith.constant dense<0.000000e+00> : vector<2x32xf32>
    %421 = tpu.matmul %415, %14, %cst_97 {dimension_numbers = #tpu.dot_dimension_numbers<[1], [0], [0], [1], [0, 0, 1, 1], [], []>} : vector<2x32xf32>, vector<32x32xf32>, vector<2x32xf32> -> vector<2x32xf32>
    %422 = vector.broadcast %16 : vector<1x32xf32> to vector<2x32xf32>
    %423 = arith.addf %421, %422 : vector<2x32xf32>
    %424 = arith.addf %416, %420 : vector<2x64xf32>
    %425 = arith.negf %424 : vector<2x64xf32>
    %426 = math.exp %425 : vector<2x64xf32>
    %cst_98 = arith.constant 1.000000e+00 : f32
    %427 = vector.broadcast %cst_98 : f32 to vector<2x64xf32>
    %428 = arith.addf %427, %426 : vector<2x64xf32>
    %429 = arith.divf %427, %428 : vector<2x64xf32>
    %430 = vector.extract_strided_slice %429 {offsets = [0, 0], sizes = [2, 32], strides = [1, 1]} : vector<2x64xf32> to vector<2x32xf32>
    %431 = vector.extract_strided_slice %429 {offsets = [0, 32], sizes = [2, 32], strides = [1, 1]} : vector<2x64xf32> to vector<2x32xf32>
    %432 = arith.mulf %430, %423 : vector<2x32xf32>
    %433 = arith.addf %417, %432 : vector<2x32xf32>
    %434 = math.tanh %433 : vector<2x32xf32>
    %cst_99 = arith.constant 1.000000e+00 : f32
    %435 = vector.broadcast %cst_99 : f32 to vector<2x32xf32>
    %436 = arith.subf %435, %431 : vector<2x32xf32>
    %437 = arith.mulf %436, %434 : vector<2x32xf32>
    %438 = arith.mulf %431, %415 : vector<2x32xf32>
    %439 = arith.addf %437, %438 : vector<2x32xf32>
    %440 = tpu.concatenate %271, %295, %319, %343, %367, %391, %415, %439 in 0 : vector<2x32xf32>, vector<2x32xf32>, vector<2x32xf32>, vector<2x32xf32>, vector<2x32xf32>, vector<2x32xf32>, vector<2x32xf32>, vector<2x32xf32> -> vector<16x32xf32>
    %cst_100 = arith.constant dense<0.000000e+00> : vector<16x32xf32>
    %441 = tpu.matmul %440, %21, %cst_100 {dimension_numbers = #tpu.dot_dimension_numbers<[1], [0], [0], [1], [0, 0, 1, 1], [], []>} : vector<16x32xf32>, vector<32x32xf32>, vector<16x32xf32> -> vector<16x32xf32>
    %442 = vector.broadcast %22 : vector<1x32xf32> to vector<16x32xf32>
    %443 = arith.addf %441, %442 : vector<16x32xf32>
    %444 = math.tanh %443 : vector<16x32xf32>
    %445 = arith.addf %444, %238 : vector<16x32xf32>
    %446 = arith.mulf %445, %241 : vector<16x32xf32>
    %cst_101 = arith.constant 0.000000e+00 : f32
    %447 = vector.broadcast %cst_101 : f32 to vector<2x32xf32>
    %448 = vector.extract_strided_slice %446 {offsets = [0, 0], sizes = [2, 32], strides = [1, 1]} : vector<16x32xf32> to vector<2x32xf32>
    %449 = arith.addf %447, %448 : vector<2x32xf32>
    %450 = vector.extract_strided_slice %446 {offsets = [2, 0], sizes = [2, 32], strides = [1, 1]} : vector<16x32xf32> to vector<2x32xf32>
    %451 = arith.addf %449, %450 : vector<2x32xf32>
    %452 = vector.extract_strided_slice %446 {offsets = [4, 0], sizes = [2, 32], strides = [1, 1]} : vector<16x32xf32> to vector<2x32xf32>
    %453 = arith.addf %451, %452 : vector<2x32xf32>
    %454 = vector.extract_strided_slice %446 {offsets = [6, 0], sizes = [2, 32], strides = [1, 1]} : vector<16x32xf32> to vector<2x32xf32>
    %455 = arith.addf %453, %454 : vector<2x32xf32>
    %456 = vector.extract_strided_slice %446 {offsets = [8, 0], sizes = [2, 32], strides = [1, 1]} : vector<16x32xf32> to vector<2x32xf32>
    %457 = arith.addf %455, %456 : vector<2x32xf32>
    %458 = vector.extract_strided_slice %446 {offsets = [10, 0], sizes = [2, 32], strides = [1, 1]} : vector<16x32xf32> to vector<2x32xf32>
    %459 = arith.addf %457, %458 : vector<2x32xf32>
    %460 = vector.extract_strided_slice %446 {offsets = [12, 0], sizes = [2, 32], strides = [1, 1]} : vector<16x32xf32> to vector<2x32xf32>
    %461 = arith.addf %459, %460 : vector<2x32xf32>
    %462 = vector.extract_strided_slice %446 {offsets = [14, 0], sizes = [2, 32], strides = [1, 1]} : vector<16x32xf32> to vector<2x32xf32>
    %463 = arith.addf %461, %462 : vector<2x32xf32>
    %c0_102 = arith.constant 0 : index
    %c0_103 = arith.constant 0 : index
    %464 = vector.load %arg15[%c0_102, %c0_103] : memref<32x1xf32, #tpu.memory_space<vmem>>, vector<32x1xf32>
    %cst_104 = arith.constant dense<0.000000e+00> : vector<2x1xf32>
    %465 = tpu.matmul %463, %464, %cst_104 {dimension_numbers = #tpu.dot_dimension_numbers<[1], [0], [0], [1], [0, 0, 1, 1], [], []>} : vector<2x32xf32>, vector<32x1xf32>, vector<2x1xf32> -> vector<2x1xf32>
    %c0_105 = arith.constant 0 : index
    %c0_106 = arith.constant 0 : index
    %466 = vector.load %arg16[%c0_105, %c0_106] : memref<1x1xf32, #tpu.memory_space<vmem>>, vector<1x1xf32>
    %467 = vector.broadcast %466 : vector<1x1xf32> to vector<2x1xf32>
    %468 = arith.addf %465, %467 : vector<2x1xf32>
    %469 = arith.negf %468 : vector<2x1xf32>
    %470 = math.exp %469 : vector<2x1xf32>
    %cst_107 = arith.constant 1.000000e+00 : f32
    %471 = vector.broadcast %cst_107 : f32 to vector<2x1xf32>
    %472 = arith.addf %471, %470 : vector<2x1xf32>
    %473 = arith.divf %471, %472 : vector<2x1xf32>
    %c0_108 = arith.constant 0 : index
    %c0_109 = arith.constant 0 : index
    %474 = vector.load %arg17[%c0_108, %c0_109] : memref<2x1xf32, #tpu.memory_space<vmem>>, vector<2x1xf32>
    tpu.vector_store %arg17[%c0_108, %c0_109], %473 {strides = array<i32>} : memref<2x1xf32, #tpu.memory_space<vmem>>, vector<2x1xf32>,
    return
  }
}

</mosaic_0001>

<bundles_post_ra>
// kernel: tpu_custom_call.1
= control target key start
LH: loop header
LB: loop body
LE: loop exit
PB: predicated region body
PF: predicated region fallthrough
CT: control target
= control target key end

     0   :  { %s2893_s0 = inlined_call_operand.hbm [shape: f32[16,32], index: 0, kind: input, shape index: {}]   ;;  %s2894_s1 = inlined_call_operand.vmem [shape: f32[32,96], index: 1, kind: input, shape index: {}]   ;;  %s2895_s2 = inlined_call_operand.hbm [shape: f32[32,96], index: 2, kind: input, shape index: {}]   ;;  %s2896_s3 = inlined_call_operand.vmem [shape: f32[1,96], index: 3, kind: input, shape index: {}]   ;;  %s2897_s4 = inlined_call_operand.vmem [shape: f32[1,96], index: 4, kind: input, shape index: {}]   ;;  %s2898_s5 = inlined_call_operand.hbm [shape: f32[32,32], index: 5, kind: input, shape index: {}]   ;;  %s2899_s6 = inlined_call_operand.vmem [shape: f32[1,32], index: 6, kind: input, shape index: {}]   ;;  %s2900_s7 = inlined_call_operand.hbm [shape: f32[32,32], index: 7, kind: input, shape index: {}]   ;;  %s2901_s8 = inlined_call_operand.vmem [shape: f32[1,32], index: 8, kind: input, shape index: {}]   ;;  %s2902_s9 = inlined_call_operand.hbm [shape: f32[32,96], index: 9, kind: input, shape index: {}]   ;;  %s2903_s10 = inlined_call_operand.hbm [shape: f32[32,96], index: 10, kind: input, shape index: {}]   ;;  %s2904_s11 = inlined_call_operand.vmem [shape: f32[1,96], index: 11, kind: input, shape index: {}]   ;;  %s2905_s12 = inlined_call_operand.vmem [shape: f32[1,96], index: 12, kind: input, shape index: {}]   ;;  %s2906_s13 = inlined_call_operand.hbm [shape: f32[32,32], index: 13, kind: input, shape index: {}]   ;;  %s2907_s14 = inlined_call_operand.vmem [shape: f32[1,32], index: 14, kind: input, shape index: {}]   ;;  %s2908_s15 = inlined_call_operand.vmem [shape: f32[32,1], index: 15, kind: input, shape index: {}]   ;;  %s2909_s16 = inlined_call_operand.<no memory space> [shape: f32[1,1], index: 16, kind: input, shape index: {}]   ;;  %s2910_s17 = inlined_call_operand.vmem [shape: f32[2,1], index: 17, kind: output, shape index: {}]  }
   0x1   :  { %2912 = sst [smem:[#allocation18_spill]] %s2893_s0  ;;  %v22_v0 = vstv %s2909_s16 }
   0x2   :  { %2913 = sst [smem:[#allocation19_spill]] %s2894_s1  ;;  %23 = vst [vmem:[#allocation2] sm:$0x1] %v22_v0 }
   0x3   :  { %24 = vsyncpa [#allocation4], 0 }
   0x4   :  { %25 = vsyncpa [#allocation6], 0 }
   0x5   :  { %26 = vsyncpa [#allocation9], 0 }
   0x6   :  { %27 = vsyncpa [#allocation12], 0  ;;  %s47_s28 = sshll.u32 %s2895_s2, 4  ;;  %s2293_s29 = smov [#allocation5]   ;;  %s48_s28 = int_to_ptr.hbm [resolvable:$true] %s47_s28 }
   0x7   :  { %s49_s0 = sshll.u32 %s2293_s29, 4  ;;  %s79_s19 = sshll.u32 %s2900_s7, 4  ;;  %s50_s0 = int_to_ptr.vmem [resolvable:$true] %s49_s0  ;;  %s80_s19 = int_to_ptr.hbm [resolvable:$true] %s79_s19 }
   0x8   :  { %s2294_s1 = smov 128   ;;  %s2295_s20 = smov 8  }
   0x9   :  { %55 = dma.hbm_to_vmem [thread:$0]  %s48_s28, 512, %s50_s0, [#allocation6], %s2294_s1, %s2294_s1, %s2295_s20  }
   0xa   :  { %s2296_s16 = smov [#allocation8]   ;;  %s107_s2 = sshll.u32 %s2903_s10, 4  ;;  %s108_s2 = int_to_ptr.hbm [resolvable:$true] %s107_s2 }
   0xb   :  { %s81_s21 = sshll.u32 %s2296_s16, 4  ;;  %s2914_s25 = sld [smem:[#allocation18_spill]]  ;;  %s82_s21 = int_to_ptr.vmem [resolvable:$true] %s81_s21 }
   0xc   :  { %87 = dma.hbm_to_vmem [thread:$0]  %s80_s19, 512, %s82_s21, [#allocation9], %s2294_s1, %s2294_s1, %s2295_s20  }
   0xd   :  { %s2297_s27 = smov [#allocation11]   ;;  %s2298_s28 = smov [#allocation3]  }
   0xe   :  { %s109_s29 = sshll.u32 %s2297_s27, 4  ;;  %s34_s10 = sshll.u32 %s2298_s28, 4  ;;  %s110_s29 = int_to_ptr.vmem [resolvable:$true] %s109_s29  ;;  %s35_s10 = int_to_ptr.vmem [resolvable:$true] %s34_s10 }
   0xf   :  { %115 = dma.hbm_to_vmem [thread:$0]  %s108_s2, 512, %s110_s29, [#allocation12], %s2294_s1, %s2294_s1, %s2295_s20  }
  0x10   :  { %s64_s18 = sshll.u32 %s2898_s5, 4  ;;  %s94_s21 = sshll.u32 %s2902_s9, 4  ;;  %s65_s18 = int_to_ptr.hbm [resolvable:$true] %s64_s18  ;;  %s95_s21 = int_to_ptr.hbm [resolvable:$true] %s94_s21 }
  0x11   :  { %s32_s26 = sshll.u32 %s2914_s25, 4  ;;  %s2299_s22 = smov [#allocation7]   ;;  %s33_s26 = int_to_ptr.hbm [resolvable:$true] %s32_s26 }
  0x12   :  { %40 = dma.hbm_to_vmem [thread:$0]  %s33_s26, 256, %s35_s10, [#allocation4], %s2294_s1, %s2294_s1, %s2295_s20  }
  0x13   :  { %s66_s23 = sshll.u32 %s2299_s22, 4  ;;  %s2300_s2 = smov [#allocation10]   ;;  %s67_s23 = int_to_ptr.vmem [resolvable:$true] %s66_s23 }
  0x14   :  { %72 = dma.hbm_to_vmem [thread:$0]  %s65_s18, 512, %s67_s23, [#allocation6], %s2294_s1, %s2294_s1, %s2295_s20  }
  0x15   :  { %s96_s5 = sshll.u32 %s2300_s2, 4  ;;  %s124_s25 = sshll.u32 %s2906_s13, 4  ;;  %s97_s5 = int_to_ptr.vmem [resolvable:$true] %s96_s5  ;;  %s125_s25 = int_to_ptr.hbm [resolvable:$true] %s124_s25 }
  0x16   :  { %102 = dma.hbm_to_vmem [thread:$0]  %s95_s21, 512, %s97_s5, [#allocation9], %s2294_s1, %s2294_s1, %s2295_s20  }
  0x17   :  { %s2301_s9 = smov [#allocation13]  }
  0x18   :  { %s126_s26 = sshll.u32 %s2301_s9, 4  ;;  %s127_s26 = int_to_ptr.vmem [resolvable:$true] %s126_s26 }
  0x19   :  { %132 = dma.hbm_to_vmem [thread:$0]  %s125_s25, 512, %s127_s26, [#allocation12], %s2294_s1, %s2294_s1, %s2295_s20  }
  0x1a   :  { %2285 = dma.done.wait [#allocation4], 256  }
  0x1b   :  { %2286 = vsyncadd [#allocation4], 4294967040 }
  0x1c   :  { %2287 = dma.done.wait [#allocation6], 1024  }
  0x1d   :  { %2288 = vsyncadd [#allocation6], 4294966272 }
  0x1e   :  { %2289 = dma.done.wait [#allocation9], 1024  }
  0x1f   :  { %2290 = vsyncadd [#allocation9], 4294966272 }
  0x20   :  { %2291 = dma.done.wait [#allocation12], 1024  }
  0x21   :  { %2292 = vsyncadd [#allocation12], 4294966272  ;;  %v2440_v1 = vld [vmem:[#allocation5 + $0x10] sm:$0xff]  ;;  %v2442_v2 = vld [vmem:[#allocation5 + $0x18] sm:$0xff]  ;;  %s2915_s29 = sld [smem:[#allocation19_spill]]  ;;  %s2302_s0 = smov 64  }
  0x22   :  { %v1984_v3 = vpack.i.bf16 %v2440_v1, %v2442_v2  ;;  %255 = vmatpush.msra.mxu1 %v2442_v2  ;;  %355 = vmatpush.msra.mxu3 %v2442_v2  ;;  %v2454_v6 = vld [vmem:[#allocation5] sm:$0xff]  ;;  %v2456_v7 = vld [vmem:[#allocation5 + $0x8] sm:$0xff]  ;;  %v167_v10 = vld [vmem:[#allocation3] sm:$0xff]  ;;  %vm207_vm0 = vcmask 261120   ;;  %v2303_v12 = vmov 0.0  }
  0x23   :  { %v1989_v11 = vpack.i.bf16 %v2454_v6, %v2456_v7  ;;  %v2487_v13 = vld [vmem:[%s2897_s4] ss:$0 sm:$0xff] }
  0x24   :  { %1985 = vrot.lane.b32.xlu0 %v1984_v3, %s2302_s0  ;;  %256 = vmatpush.msra.mxu1 %v2440_v1  ;;  %v2527_v20 = vld [vmem:[%s2896_s3] ss:$0 sm:$0xff]  ;;  %s2304_s3 = smov 96  }
  0x25   :  { %356 = vmatpush.msra.mxu3 %v2440_v1  ;;  %279 = vrot.lane.b32.xlu1 %v2487_v13, %s2302_s0 }
  0x26   :  { %257 = vmatpush.msra.mxu1 %v2456_v7 }
  0x27   :  { %v172_v4 = vld [vmem:[%s2915_s29 + $0x18] sm:$0xff]  ;;  %v171_v5 = vld [vmem:[%s2915_s29 + $0x10] sm:$0xff]  ;;  %v170_v8 = vld [vmem:[%s2915_s29 + $0x8] sm:$0xff]  ;;  %357 = vmatpush.msra.mxu3 %v2456_v7 }
  0x28   :  { %226 = vmatpush.msra.mxu0 %v172_v4  ;;  %v169_v9 = vld [vmem:[%s2915_s29] sm:$0xff]  ;;  %258 = vmatpush.msra.mxu1 %v2454_v6 }
  0x29   :  { %259 = vmatmul.f32.vlgmr.msra.gmra.mxu1 %v2303_v12  ;;  %358 = vmatpush.msra.mxu3 %v2454_v6 }
  0x2a   :  { %227 = vmatpush.msra.mxu0 %v171_v5 }
  0x2c   :  { %228 = vmatpush.msra.mxu0 %v170_v8  ;;  %1990 = vrot.lane.b32.xlu0 %v1989_v11, %s2302_s0 }
  0x2e   :  { %229 = vmatpush.msra.mxu0 %v169_v9 }
  0x2f   :  { %1918 = vmatmul.msk.f32.vlgmr.msra.gmra.mxu0 %vm207_vm0, %v167_v10 }
  0x30   :  { %537 = vmatpush.msrb.mxu0 %v2442_v2 }
  0x32   :  { %538 = vmatpush.msrb.mxu0 %v2440_v1 }
  0x34   :  { %539 = vmatpush.msrb.mxu0 %v2456_v7 }
  0x36   :  { %540 = vmatpush.msrb.mxu0 %v2454_v6 }
  0x38   :  { %709 = vmatpush.msra.mxu0 %v2442_v2 }
  0x3a   :  { %710 = vmatpush.msra.mxu0 %v2440_v1 }
  0x3c   :  { %711 = vmatpush.msra.mxu0 %v2456_v7 }
  0x3e   :  { %712 = vmatpush.msra.mxu0 %v2454_v6 }
  0x96   :  { %v1986_v14 = vpop.permute.xlu0 %1985 }
  0x97   :  { %v2491_v15 = vunpack.i.l.bf16 %v1986_v14  ;;  %v2493_v16 = vunpack.i.h.bf16 %v1986_v14  ;;  %v2534_v36 = vpop.permute.xlu1 %279 }
  0x99   :  { %294 = vmatpush.msra.mxu2 %v2491_v15  ;;  %375 = vmatpush.msrb.mxu1 %v2491_v15 }
  0x9a   :  { %466 = vmatpush.msrb.mxu3 %v2491_v15 }
  0x9b   :  { %295 = vmatpush.msra.mxu2 %v2493_v16  ;;  %376 = vmatpush.msrb.mxu1 %v2493_v16 }
  0x9c   :  { %467 = vmatpush.msrb.mxu3 %v2493_v16 }
  0x9e   :  { %v1991_v17 = vpop.permute.xlu0 %1990 }
  0x9f   :  { %v2501_v18 = vunpack.i.l.bf16 %v1991_v17  ;;  %v2503_v19 = vunpack.i.h.bf16 %v1991_v17 }
  0xa1   :  { %296 = vmatpush.msra.mxu2 %v2501_v18  ;;  %377 = vmatpush.msrb.mxu1 %v2501_v18 }
  0xa2   :  { %468 = vmatpush.msrb.mxu3 %v2501_v18 }
  0xa3   :  { %297 = vmatpush.msra.mxu2 %v2503_v19  ;;  %378 = vmatpush.msrb.mxu1 %v2503_v19 }
  0xa4   :  { %469 = vmatpush.msrb.mxu3 %v2503_v19  ;;  %298 = vmatmul.f32.vlgmr.msra.gmra.mxu2 %v2303_v12 }
  0xa5   :  { %557 = vmatpush.msra.mxu1 %v2491_v15  ;;  %446 = vmatpush.msrb.mxu2 %v2442_v2 }
  0xa6   :  { %v260_v22 = vpop.f32.mrf.mxu1 }
  0xa7   :  { %558 = vmatpush.msra.mxu1 %v2493_v16  ;;  %447 = vmatpush.msrb.mxu2 %v2440_v1  ;;  %v261_v24 = vadd.f32 %v2487_v13, %v260_v22 }
  0xa9   :  { %559 = vmatpush.msra.mxu1 %v2501_v18  ;;  %448 = vmatpush.msrb.mxu2 %v2456_v7 }
  0xab   :  { %560 = vmatpush.msra.mxu1 %v2503_v19  ;;  %449 = vmatpush.msrb.mxu2 %v2454_v6 }
  0xac   :  { %v231_v21 = vpop.f32.mrf.mxu0 }
  0xad   :  { %628 = vmatpush.msra.mxu2 %v2442_v2  ;;  %v2530_v23 = vadd.f32 %v2527_v20, %v231_v21 }
  0xaf   :  { %629 = vmatpush.msra.mxu2 %v2440_v1  ;;  %v302_v25 = vadd.f32 %v261_v24, %v2530_v23 }
  0xb1   :  { %630 = vmatpush.msra.mxu2 %v2456_v7  ;;  %v1920_v26 = vmul.f32 -1.442695, %v302_v25 }
  0xb3   :  { %631 = vmatpush.msra.mxu2 %v2454_v6  ;;  %2012 = vpow2.f32 %v1920_v26 }
  0xb9   :  { %v2013_v27 = vpop.eup %2012 }
  0xba   :  { %v306_v28 = vadd.f32 1.0, %v2013_v27 }
  0xbc   :  { %2014 = vrcp.f32 %v306_v28  ;;  %vm312_vm1 = vweird.f32 %v306_v28  ;;  %v318_v33 = vand.u32 2147483648, %v306_v28  ;;  %v316_v35 = vand.u32 2147483647, %v306_v28 }
  0xbe   :  { %v319_v37 = vor.u32 1.1754944e-38, %v318_v33  ;;  %vm317_vm4 = vcmp.eq.f32.partialorder %v316_v35, 8.507059e+37 }
  0xc2   :  { %v2015_v29 = vpop.eup %2014 }
  0xc3   :  { %v308_v30 = vmul.f32 %v2015_v29, %v306_v28  ;;  %vm313_vm2 = vweird.f32 %v2015_v29 }
  0xc4   :  { %vm314_vm3 = vmor %vm312_vm1, %vm313_vm2 }
  0xc5   :  { %v309_v31 = vsub.f32 1.0, %v308_v30 }
  0xc7   :  { %v310_v32 = vmul.f32 %v2015_v29, %v309_v31 }
  0xc9   :  { %v311_v34 = vadd.f32 %v2015_v29, %v310_v32 }
  0xcb   :  { %v315_v38 = vsel %vm314_vm3, %v2015_v29, %v311_v34 }
  0xcc   :  { %v320_v41 = vsel %vm317_vm4, %v319_v37, %v315_v38 }
  0xcd   :  { %v329_v46 = vsub.f32 1.0, %v320_v41  ;;  %v335_v48 = vmul.f32 0.0, %v320_v41 }
 0x127   :  { %v299_v39 = vpop.f32.mrf.mxu2 }
 0x128   :  { %v300_v40 = vadd.f32 %v299_v39, %v2534_v36 }
 0x12a   :  { %v322_v42 = vmul.f32 %v320_v41, %v300_v40 }
 0x12c   :  { %324 = vrot.lane.b32.xlu1 %v322_v42, %s2302_s0 }
 0x19e   :  { %v325_v43 = vpop.permute.xlu1 %324 }
 0x19f   :  { %v327_v44 = vadd.f32 %v325_v43, %v2530_v23 }
 0x1a1   :  { %2016 = vtanh.f32 %v327_v44 }
 0x1a7   :  { %v2017_v45 = vpop.eup %2016 }
 0x1a8   :  { %331 = vrot.lane.b32.xlu2 %v2017_v45, %s2304_s3 }
 0x202   :  { %v332_v47 = vpop.permute.xlu2 %331 }
 0x203   :  { %v334_v49 = vmul.f32 %v332_v47, %v329_v46 }
 0x205   :  { %v2540_v50 = vadd.f32 %v335_v48, %v334_v49 }
 0x207   :  { %339 = vrot.lane.b32.xlu2 %v2540_v50, %s2304_s3  ;;  %v422_v25 = vrot.slane %v2540_v50, 6 }
 0x261   :  { %v340_v51 = vpop.permute.xlu2 %339 }
 0x262   :  { %1921 = vmatmul.msk.f32.vlgmr.msra.gmra.mxu3 %vm207_vm0, %v340_v51  ;;  %1922 = vmatmul.msk.f32.vlgmr.msrb.gmra.mxu1 %vm207_vm0, %v340_v51 }
 0x263   :  { %648 = vmatpush.msra.mxu3 %v2491_v15  ;;  %729 = vmatpush.msrb.mxu1 %v2491_v15 }
 0x265   :  { %649 = vmatpush.msra.mxu3 %v2493_v16  ;;  %730 = vmatpush.msrb.mxu1 %v2493_v16 }
 0x267   :  { %650 = vmatpush.msra.mxu3 %v2501_v18  ;;  %731 = vmatpush.msrb.mxu1 %v2501_v18 }
 0x269   :  { %651 = vmatpush.msra.mxu3 %v2503_v19  ;;  %732 = vmatpush.msrb.mxu1 %v2503_v19 }
 0x2df   :  { %v380_v61 = vpop.f32.mrf.mxu1 }
 0x2e0   :  { %v381_v0 = vadd.f32 %v380_v61, %v2534_v36 }
 0x2e2   :  { %v407_v9 = vrot.slane %v381_v0, 6 }
 0x2e5   :  { %v360_v52 = vpop.f32.mrf.mxu3 }
 0x2e6   :  { %v361_v53 = vadd.f32 %v2487_v13, %v360_v52 }
 0x2e8   :  { %v384_v54 = vrot.slane %v361_v53, 6 }
 0x2ea   :  { %v386_v55 = vadd.f32 %v384_v54, %v2530_v23 }
 0x2ec   :  { %v1923_v56 = vmul.f32 -1.442695, %v386_v55 }
 0x2ee   :  { %2018 = vpow2.f32 %v1923_v56 }
 0x2f4   :  { %v2019_v57 = vpop.eup %2018 }
 0x2f5   :  { %v390_v58 = vadd.f32 1.0, %v2019_v57 }
 0x2f7   :  { %2020 = vrcp.f32 %v390_v58  ;;  %v402_v63 = vand.u32 2147483648, %v390_v58  ;;  %v400_v4 = vand.u32 2147483647, %v390_v58  ;;  %vm396_vm6 = vweird.f32 %v390_v58 }
 0x2f9   :  { %v403_v8 = vor.u32 1.1754944e-38, %v402_v63  ;;  %vm401_vm8 = vcmp.eq.f32.partialorder %v400_v4, 8.507059e+37 }
 0x2fd   :  { %v2021_v59 = vpop.eup %2020 }
 0x2fe   :  { %v392_v60 = vmul.f32 %v2021_v59, %v390_v58  ;;  %vm397_vm5 = vweird.f32 %v2021_v59 }
 0x2ff   :  { %vm398_vm7 = vmor %vm396_vm6, %vm397_vm5 }
 0x300   :  { %v393_v62 = vsub.f32 1.0, %v392_v60  ;;  %v2578_v60 = vld [vmem:[#allocation3 + $0x8] sm:$0xff] }
 0x301   :  { %1919 = vmatmul.msk.f32.gmra.mxu0 %vm207_vm0, %v2578_v60 }
 0x302   :  { %v394_v3 = vmul.f32 %v2021_v59, %v393_v62 }
 0x304   :  { %v395_v5 = vadd.f32 %v2021_v59, %v394_v3 }
 0x306   :  { %v399_v10 = vsel %vm398_vm7, %v2021_v59, %v395_v5 }
 0x307   :  { %v404_v11 = vsel %vm401_vm8, %v403_v8, %v399_v10 }
 0x308   :  { %v409_v14 = vmul.f32 %v407_v9, %v404_v11  ;;  %v416_v24 = vsub.f32 1.0, %v404_v11  ;;  %v424_v28 = vmul.f32 %v422_v25, %v404_v11 }
 0x30a   :  { %411 = vrot.lane.b32.xlu0 %v409_v14, %s2302_s0 }
 0x37c   :  { %v412_v17 = vpop.permute.xlu0 %411 }
 0x37d   :  { %v414_v21 = vadd.f32 %v412_v17, %v2530_v23 }
 0x37f   :  { %2022 = vtanh.f32 %v414_v21 }
 0x385   :  { %v2023_v22 = vpop.eup %2022 }
 0x386   :  { %418 = vrot.lane.b32.xlu1 %v2023_v22, %s2304_s3 }
 0x3f8   :  { %v419_v26 = vpop.permute.xlu1 %418 }
 0x3f9   :  { %v421_v27 = vmul.f32 %v419_v26, %v416_v24 }
 0x3fb   :  { %v425_v29 = vadd.f32 %v424_v28, %v421_v27 }
 0x3fd   :  { %v427_v30 = vrot.slane %v425_v29, 2  ;;  %v513_v51 = vrot.slane %v425_v29, 6 }
 0x3ff   :  { %430 = vrot.lane.b32.xlu2 %v427_v30, %s2304_s3  ;;  %v429_v3 = vadd.f32 %v427_v30, %v2540_v50  ;;  %v234_v50 = vpop.f32.mrf.mxu0 }
 0x459   :  { %v431_v31 = vpop.permute.xlu2 %430 }
 0x45a   :  { %1924 = vmatmul.msk.f32.vlgmr.msrb.gmra.mxu2 %vm207_vm0, %v431_v31  ;;  %1925 = vmatmul.msk.f32.vlgmr.msrb.gmra.mxu3 %vm207_vm0, %v431_v31 }
 0x45b   :  { %820 = vmatpush.msrb.mxu3 %v2491_v15  ;;  %800 = vmatpush.msrb.mxu2 %v2442_v2 }
 0x45d   :  { %821 = vmatpush.msrb.mxu3 %v2493_v16  ;;  %801 = vmatpush.msrb.mxu2 %v2440_v1 }
 0x45f   :  { %822 = vmatpush.msrb.mxu3 %v2501_v18  ;;  %802 = vmatpush.msrb.mxu2 %v2456_v7 }
 0x461   :  { %823 = vmatpush.msrb.mxu3 %v2503_v19  ;;  %803 = vmatpush.msrb.mxu2 %v2454_v6 }
 0x4dd   :  { %v451_v32 = vpop.f32.mrf.mxu2  ;;  %v471_v42 = vpop.f32.mrf.mxu3 }
 0x4de   :  { %v452_v33 = vadd.f32 %v2487_v13, %v451_v32  ;;  %v472_v45 = vadd.f32 %v471_v42, %v2534_v36 }
 0x4e0   :  { %v475_v34 = vrot.slane %v452_v33, 4  ;;  %v498_v53 = vrot.slane %v472_v45, 4 }
 0x4e2   :  { %v477_v35 = vadd.f32 %v475_v34, %v2530_v23 }
 0x4e4   :  { %v1926_v37 = vmul.f32 -1.442695, %v477_v35 }
 0x4e6   :  { %2024 = vpow2.f32 %v1926_v37 }
 0x4ec   :  { %v2025_v38 = vpop.eup %2024 }
 0x4ed   :  { %v481_v39 = vadd.f32 1.0, %v2025_v38 }
 0x4ef   :  { %2026 = vrcp.f32 %v481_v39  ;;  %v493_v44 = vand.u32 2147483648, %v481_v39  ;;  %v491_v47 = vand.u32 2147483647, %v481_v39  ;;  %vm487_vm10 = vweird.f32 %v481_v39 }
 0x4f1   :  { %v494_v49 = vor.u32 1.1754944e-38, %v493_v44  ;;  %vm492_vm12 = vcmp.eq.f32.partialorder %v491_v47, 8.507059e+37 }
 0x4f5   :  { %v2027_v40 = vpop.eup %2026 }
 0x4f6   :  { %v483_v41 = vmul.f32 %v2027_v40, %v481_v39  ;;  %vm488_vm9 = vweird.f32 %v2027_v40 }
 0x4f7   :  { %vm489_vm11 = vmor %vm487_vm10, %vm488_vm9 }
 0x4f8   :  { %v484_v43 = vsub.f32 1.0, %v483_v41 }
 0x4fa   :  { %v485_v46 = vmul.f32 %v2027_v40, %v484_v43  ;;  %v2606_v43 = vadd.f32 %v2527_v20, %v234_v50 }
 0x4fc   :  { %v486_v48 = vadd.f32 %v2027_v40, %v485_v46 }
 0x4fe   :  { %v490_v52 = vsel %vm489_vm11, %v2027_v40, %v486_v48 }
 0x4ff   :  { %v495_v54 = vsel %vm492_vm12, %v494_v49, %v490_v52 }
 0x500   :  { %v500_v55 = vmul.f32 %v498_v53, %v495_v54  ;;  %v515_v56 = vmul.f32 %v513_v51, %v495_v54  ;;  %v507_v61 = vsub.f32 1.0, %v495_v54 }
 0x502   :  { %502 = vrot.lane.b32.xlu0 %v500_v55, %s2302_s0 }
 0x574   :  { %v503_v57 = vpop.permute.xlu0 %502 }
 0x575   :  { %v505_v58 = vadd.f32 %v503_v57, %v2530_v23 }
 0x577   :  { %2028 = vtanh.f32 %v505_v58 }
 0x57d   :  { %v2029_v59 = vpop.eup %2028 }
 0x57e   :  { %509 = vrot.lane.b32.xlu1 %v2029_v59, %s2304_s3 }
 0x5f0   :  { %v510_v62 = vpop.permute.xlu1 %509 }
 0x5f1   :  { %v512_v63 = vmul.f32 %v510_v62, %v507_v61 }
 0x5f3   :  { %v516_v0 = vadd.f32 %v515_v56, %v512_v63 }
 0x5f5   :  { %v518_v4 = vrot.slane %v516_v0, 4  ;;  %v604_v26 = vrot.slane %v516_v0, 6 }
 0x5f7   :  { %521 = vrot.lane.b32.xlu2 %v518_v4, %s2304_s3  ;;  %v2584_v5 = vadd.f32 %v518_v4, %v429_v3 }
 0x651   :  { %v522_v8 = vpop.permute.xlu2 %521 }
 0x652   :  { %1927 = vmatmul.msk.f32.vlgmr.msrb.gmra.mxu0 %vm207_vm0, %v522_v8  ;;  %1928 = vmatmul.msk.f32.vlgmr.msra.gmra.mxu1 %vm207_vm0, %v522_v8 }
 0x653   :  { %911 = vmatpush.msra.mxu1 %v2491_v15  ;;  %891 = vmatpush.msrb.mxu0 %v2442_v2 }
 0x655   :  { %912 = vmatpush.msra.mxu1 %v2493_v16  ;;  %892 = vmatpush.msrb.mxu0 %v2440_v1 }
 0x657   :  { %913 = vmatpush.msra.mxu1 %v2501_v18  ;;  %893 = vmatpush.msrb.mxu0 %v2456_v7 }
 0x659   :  { %914 = vmatpush.msra.mxu1 %v2503_v19  ;;  %894 = vmatpush.msrb.mxu0 %v2454_v6 }
 0x6cf   :  { %v542_v9 = vpop.f32.mrf.mxu0  ;;  %v562_v17 = vpop.f32.mrf.mxu1 }
 0x6d0   :  { %v543_v10 = vadd.f32 %v2487_v13, %v542_v9  ;;  %v563_v19 = vadd.f32 %v562_v17, %v2534_v36 }
 0x6d2   :  { %v566_v11 = vrot.slane %v543_v10, 2  ;;  %v589_v28 = vrot.slane %v563_v19, 2 }
 0x6d4   :  { %v568_v15 = vadd.f32 %v566_v11, %v2530_v23 }
 0x6d6   :  { %v1929_v2 = vmul.f32 -1.442695, %v568_v15 }
 0x6d8   :  { %2030 = vpow2.f32 %v1929_v2 }
 0x6de   :  { %v2031_v16 = vpop.eup %2030 }
 0x6df   :  { %v572_v14 = vadd.f32 1.0, %v2031_v16 }
 0x6e1   :  { %2032 = vrcp.f32 %v572_v14  ;;  %v584_v21 = vand.u32 2147483648, %v572_v14  ;;  %v582_v22 = vand.u32 2147483647, %v572_v14  ;;  %vm578_vm14 = vweird.f32 %v572_v14 }
 0x6e3   :  { %v585_v25 = vor.u32 1.1754944e-38, %v584_v21  ;;  %vm583_vm1 = vcmp.eq.f32.partialorder %v582_v22, 8.507059e+37 }
 0x6e7   :  { %v2033_v1 = vpop.eup %2032 }
 0x6e8   :  { %v574_v18 = vmul.f32 %v2033_v1, %v572_v14  ;;  %vm579_vm13 = vweird.f32 %v2033_v1 }
 0x6e9   :  { %vm580_vm15 = vmor %vm578_vm14, %vm579_vm13 }
 0x6ea   :  { %v575_v7 = vsub.f32 1.0, %v574_v18 }
 0x6ec   :  { %v576_v6 = vmul.f32 %v2033_v1, %v575_v7 }
 0x6ee   :  { %v577_v24 = vadd.f32 %v2033_v1, %v576_v6 }
 0x6f0   :  { %v581_v27 = vsel %vm580_vm15, %v2033_v1, %v577_v24 }
 0x6f1   :  { %v586_v29 = vsel %vm583_vm1, %v585_v25, %v581_v27 }
 0x6f2   :  { %v591_v30 = vmul.f32 %v589_v28, %v586_v29  ;;  %v606_v31 = vmul.f32 %v604_v26, %v586_v29  ;;  %v598_v35 = vsub.f32 1.0, %v586_v29 }
 0x6f4   :  { %593 = vrot.lane.b32.xlu0 %v591_v30, %s2302_s0 }
 0x766   :  { %v594_v32 = vpop.permute.xlu0 %593 }
 0x767   :  { %v596_v33 = vadd.f32 %v594_v32, %v2530_v23 }
 0x769   :  { %2034 = vtanh.f32 %v596_v33 }
 0x76f   :  { %v2035_v34 = vpop.eup %2034 }
 0x770   :  { %600 = vrot.lane.b32.xlu1 %v2035_v34, %s2304_s3 }
 0x7e2   :  { %v601_v37 = vpop.permute.xlu1 %600 }
 0x7e3   :  { %v603_v38 = vmul.f32 %v601_v37, %v598_v35 }
 0x7e5   :  { %v607_v39 = vadd.f32 %v606_v31, %v603_v38 }
 0x7e7   :  { %v609_v40 = vrot.slane %v607_v39, 6 }
 0x7e9   :  { %612 = vrot.lane.b32.xlu2 %v609_v40, %s2304_s3  ;;  %v611_v9 = vadd.f32 %v609_v40, %v2584_v5 }
 0x843   :  { %v613_v41 = vpop.permute.xlu2 %612 }
 0x844   :  { %1930 = vmatmul.msk.f32.vlgmr.msra.gmra.mxu2 %vm207_vm0, %v613_v41  ;;  %1931 = vmatmul.msk.f32.vlgmr.msra.gmra.mxu3 %vm207_vm0, %v613_v41 }
 0x8c7   :  { %v633_v42 = vpop.f32.mrf.mxu2  ;;  %v653_v55 = vpop.f32.mrf.mxu3 }
 0x8c8   :  { %v634_v23 = vadd.f32 %v2487_v13, %v633_v42  ;;  %v654_v57 = vadd.f32 %v653_v55, %v2534_v36 }
 0x8ca   :  { %v656_v44 = vadd.f32 %v634_v23, %v2606_v43 }
 0x8cc   :  { %v1932_v45 = vmul.f32 -1.442695, %v656_v44 }
 0x8ce   :  { %2036 = vpow2.f32 %v1932_v45 }
 0x8d4   :  { %v2037_v46 = vpop.eup %2036 }
 0x8d5   :  { %v660_v47 = vadd.f32 1.0, %v2037_v46 }
 0x8d7   :  { %2038 = vrcp.f32 %v660_v47  ;;  %v672_v52 = vand.u32 2147483648, %v660_v47  ;;  %v670_v54 = vand.u32 2147483647, %v660_v47  ;;  %vm666_vm3 = vweird.f32 %v660_v47 }
 0x8d9   :  { %v673_v20 = vor.u32 1.1754944e-38, %v672_v52  ;;  %vm671_vm5 = vcmp.eq.f32.partialorder %v670_v54, 8.507059e+37 }
 0x8dd   :  { %v2039_v48 = vpop.eup %2038 }
 0x8de   :  { %v662_v49 = vmul.f32 %v2039_v48, %v660_v47  ;;  %vm667_vm2 = vweird.f32 %v2039_v48 }
 0x8df   :  { %vm668_vm4 = vmor %vm666_vm3, %vm667_vm2  ;;  %vm1025_vm3 = vcmask 1041408  }
 0x8e0   :  { %v663_v51 = vsub.f32 1.0, %v662_v49 }
 0x8e2   :  { %v664_v53 = vmul.f32 %v2039_v48, %v663_v51 }
 0x8e4   :  { %v665_v56 = vadd.f32 %v2039_v48, %v664_v53 }
 0x8e6   :  { %v669_v58 = vsel %vm668_vm4, %v2039_v48, %v665_v56  ;;  %vm1027_vm4 = vcmask 1043456  }
 0x8e7   :  { %v674_v59 = vsel %vm671_vm5, %v673_v20, %v669_v58  ;;  %vm1029_vm5 = vcmask 1045504  }
 0x8e8   :  { %v676_v61 = vmul.f32 %v674_v59, %v654_v57  ;;  %v683_v3 = vsub.f32 1.0, %v674_v59  ;;  %v689_v8 = vmul.f32 %v674_v59, %v609_v40 }
 0x8ea   :  { %678 = vrot.lane.b32.xlu0 %v676_v61, %s2302_s0 }
 0x95c   :  { %v679_v62 = vpop.permute.xlu0 %678 }
 0x95d   :  { %v681_v63 = vadd.f32 %v679_v62, %v2606_v43 }
 0x95f   :  { %2040 = vtanh.f32 %v681_v63 }
 0x965   :  { %v2041_v0 = vpop.eup %2040 }
 0x966   :  { %685 = vrot.lane.b32.xlu1 %v2041_v0, %s2304_s3 }
 0x9d8   :  { %v686_v4 = vpop.permute.xlu1 %685 }
 0x9d9   :  { %v688_v50 = vmul.f32 %v686_v4, %v683_v3 }
 0x9db   :  { %v690_v10 = vadd.f32 %v689_v8, %v688_v50 }
 0x9dd   :  { %v691_v11 = vadd.f32 %v690_v10, %v611_v9  ;;  %693 = vrot.lane.b32.xlu2 %v690_v10, %s2304_s3  ;;  %v776_v31 = vrot.slane %v690_v10, 6 }
 0xa37   :  { %v694_v15 = vpop.permute.xlu2 %693 }
 0xa38   :  { %1933 = vmatmul.msk.f32.vlgmr.msra.gmra.mxu0 %vm207_vm0, %v694_v15  ;;  %1934 = vmatmul.msk.f32.vlgmr.msrb.gmra.mxu1 %vm207_vm0, %v694_v15 }
 0xab5   :  { %v714_v2 = vpop.f32.mrf.mxu0  ;;  %v734_v19 = vpop.f32.mrf.mxu1 }
 0xab6   :  { %v715_v16 = vadd.f32 %v2487_v13, %v714_v2  ;;  %v735_v24 = vadd.f32 %v734_v19, %v2534_v36 }
 0xab8   :  { %v738_v14 = vrot.slane %v715_v16, 6  ;;  %v761_v30 = vrot.slane %v735_v24, 6 }
 0xaba   :  { %v740_v1 = vadd.f32 %v738_v14, %v2606_v43 }
 0xabc   :  { %v1935_v18 = vmul.f32 -1.442695, %v740_v1 }
 0xabe   :  { %2042 = vpow2.f32 %v1935_v18 }
 0xac4   :  { %v2043_v17 = vpop.eup %2042 }
 0xac5   :  { %v744_v7 = vadd.f32 1.0, %v2043_v17 }
 0xac7   :  { %2044 = vrcp.f32 %v744_v7  ;;  %v756_v22 = vand.u32 2147483648, %v744_v7  ;;  %v754_v26 = vand.u32 2147483647, %v744_v7  ;;  %vm750_vm7 = vweird.f32 %v744_v7 }
 0xac9   :  { %v757_v28 = vor.u32 1.1754944e-38, %v756_v22  ;;  %vm755_vm9 = vcmp.eq.f32.partialorder %v754_v26, 8.507059e+37 }
 0xacd   :  { %v2045_v5 = vpop.eup %2044 }
 0xace   :  { %v746_v21 = vmul.f32 %v2045_v5, %v744_v7  ;;  %vm751_vm6 = vweird.f32 %v2045_v5 }
 0xacf   :  { %vm752_vm8 = vmor %vm750_vm7, %vm751_vm6 }
 0xad0   :  { %v747_v6 = vsub.f32 1.0, %v746_v21 }
 0xad2   :  { %v748_v25 = vmul.f32 %v2045_v5, %v747_v6 }
 0xad4   :  { %v749_v27 = vadd.f32 %v2045_v5, %v748_v25 }
 0xad6   :  { %v753_v29 = vsel %vm752_vm8, %v2045_v5, %v749_v27 }
 0xad7   :  { %v758_v32 = vsel %vm755_vm9, %v757_v28, %v753_v29 }
 0xad8   :  { %v763_v33 = vmul.f32 %v761_v30, %v758_v32  ;;  %v778_v34 = vmul.f32 %v776_v31, %v758_v32  ;;  %v770_v39 = vsub.f32 1.0, %v758_v32 }
 0xada   :  { %765 = vrot.lane.b32.xlu0 %v763_v33, %s2302_s0 }
 0xb4c   :  { %v766_v35 = vpop.permute.xlu0 %765 }
 0xb4d   :  { %v768_v37 = vadd.f32 %v766_v35, %v2606_v43 }
 0xb4f   :  { %2046 = vtanh.f32 %v768_v37 }
 0xb55   :  { %v2047_v38 = vpop.eup %2046 }
 0xb56   :  { %772 = vrot.lane.b32.xlu1 %v2047_v38, %s2304_s3 }
 0xbc8   :  { %v773_v40 = vpop.permute.xlu1 %772 }
 0xbc9   :  { %v775_v41 = vmul.f32 %v773_v40, %v770_v39 }
 0xbcb   :  { %v779_v42 = vadd.f32 %v778_v34, %v775_v41 }
 0xbcd   :  { %v781_v23 = vrot.slane %v779_v42, 2  ;;  %v867_v0 = vrot.slane %v779_v42, 6 }
 0xbcf   :  { %784 = vrot.lane.b32.xlu2 %v781_v23, %s2304_s3  ;;  %v783_v44 = vadd.f32 %v781_v23, %v691_v11 }
 0xc29   :  { %v785_v45 = vpop.permute.xlu2 %784 }
 0xc2a   :  { %1936 = vmatmul.msk.f32.vlgmr.msrb.gmra.mxu2 %vm207_vm0, %v785_v45  ;;  %1937 = vmatmul.msk.f32.vlgmr.msrb.gmra.mxu3 %vm207_vm0, %v785_v45  ;;  %v197_v45 = vld [vmem:[#allocation8 + $0x18] sm:$0xff] }
 0xc2b   :  { %1010 = vmatpush.msra.mxu3 %v197_v45 }
 0xcad   :  { %v805_v46 = vpop.f32.mrf.mxu2  ;;  %v825_v56 = vpop.f32.mrf.mxu3 }
 0xcae   :  { %v806_v47 = vadd.f32 %v2487_v13, %v805_v46  ;;  %v826_v58 = vadd.f32 %v825_v56, %v2534_v36  ;;  %v191_v46 = vld [vmem:[#allocation7 + $0x10] sm:$0xff] }
 0xcb0   :  { %v829_v48 = vrot.slane %v806_v47, 4  ;;  %v852_v4 = vrot.slane %v826_v58, 4  ;;  %v196_v47 = vld [vmem:[#allocation8 + $0x10] sm:$0xff] }
 0xcb1   :  { %1011 = vmatpush.msra.mxu3 %v196_v47  ;;  %v2643_v58 = vld [vmem:[#allocation11 + $0x10] sm:$0xff] }
 0xcb2   :  { %v831_v49 = vadd.f32 %v829_v48, %v2606_v43  ;;  %v190_v48 = vld [vmem:[#allocation7 + $0x8] sm:$0xff] }
 0xcb4   :  { %v1938_v51 = vmul.f32 -1.442695, %v831_v49  ;;  %v195_v49 = vld [vmem:[#allocation8 + $0x8] sm:$0xff] }
 0xcb5   :  { %1012 = vmatpush.msra.mxu3 %v195_v49 }
 0xcb6   :  { %2048 = vpow2.f32 %v1938_v51  ;;  %v189_v51 = vld [vmem:[#allocation7] sm:$0xff] }
 0xcbc   :  { %v2049_v52 = vpop.eup %2048 }
 0xcbd   :  { %v835_v53 = vadd.f32 1.0, %v2049_v52  ;;  %v194_v52 = vld [vmem:[#allocation8] sm:$0xff] }
 0xcbe   :  { %1013 = vmatpush.msra.mxu3 %v194_v52 }
 0xcbf   :  { %2050 = vrcp.f32 %v835_v53  ;;  %v847_v57 = vand.u32 2147483648, %v835_v53  ;;  %v845_v61 = vand.u32 2147483647, %v835_v53  ;;  %vm841_vm11 = vweird.f32 %v835_v53 }
 0xcc1   :  { %v848_v63 = vor.u32 1.1754944e-38, %v847_v57  ;;  %vm846_vm13 = vcmp.eq.f32.partialorder %v845_v61, 8.507059e+37  ;;  %v2647_v61 = vld [vmem:[#allocation11] sm:$0xff] }
 0xcc5   :  { %v2051_v54 = vpop.eup %2050 }
 0xcc6   :  { %v837_v55 = vmul.f32 %v2051_v54, %v835_v53  ;;  %vm842_vm10 = vweird.f32 %v2051_v54 }
 0xcc7   :  { %vm843_vm12 = vmor %vm841_vm11, %vm842_vm10 }
 0xcc8   :  { %v838_v20 = vsub.f32 1.0, %v837_v55 }
 0xcca   :  { %v839_v59 = vmul.f32 %v2051_v54, %v838_v20 }
 0xccc   :  { %v840_v62 = vadd.f32 %v2051_v54, %v839_v59  ;;  %v2645_v59 = vld [vmem:[#allocation11 + $0x18] sm:$0xff] }
 0xccd   :  { %1092 = vmatpush.msrb.mxu1 %v2645_v59  ;;  %1191 = vmatpush.msrb.mxu3 %v2645_v59 }
 0xcce   :  { %v844_v3 = vsel %vm843_vm12, %v2051_v54, %v840_v62  ;;  %v1994_v62 = vpack.i.bf16 %v2643_v58, %v2645_v59 }
 0xccf   :  { %v849_v8 = vsel %vm846_vm13, %v848_v63, %v844_v3  ;;  %v2651_v63 = vld [vmem:[#allocation11 + $0x8] sm:$0xff]  ;;  %1093 = vmatpush.msrb.mxu1 %v2643_v58  ;;  %1192 = vmatpush.msrb.mxu3 %v2643_v58 }
 0xcd0   :  { %v854_v50 = vmul.f32 %v852_v4, %v849_v8  ;;  %v869_v9 = vmul.f32 %v867_v0, %v849_v8  ;;  %v861_v2 = vsub.f32 1.0, %v849_v8  ;;  %v1999_v0 = vpack.i.bf16 %v2647_v61, %v2651_v63  ;;  %v182_v4 = vld [vmem:[#allocation10 + $0x18] sm:$0xff]  ;;  %v181_v8 = vld [vmem:[#allocation10 + $0x10] sm:$0xff] }
 0xcd1   :  { %1094 = vmatpush.msrb.mxu1 %v2651_v63  ;;  %1193 = vmatpush.msrb.mxu3 %v2651_v63 }
 0xcd2   :  { %856 = vrot.lane.b32.xlu0 %v854_v50, %s2302_s0  ;;  %1066 = vmatpush.msra.mxu0 %v182_v4  ;;  %v180_v50 = vld [vmem:[#allocation10 + $0x8] sm:$0xff] }
 0xcd3   :  { %1095 = vmatpush.msrb.mxu1 %v2647_v61  ;;  %1194 = vmatpush.msrb.mxu3 %v2647_v61 }
 0xcd4   :  { %1067 = vmatpush.msra.mxu0 %v181_v8 }
 0xcd6   :  { %1068 = vmatpush.msra.mxu0 %v180_v50 }
 0xd44   :  { %v857_v10 = vpop.permute.xlu0 %856 }
 0xd45   :  { %v859_v11 = vadd.f32 %v857_v10, %v2606_v43 }
 0xd47   :  { %2052 = vtanh.f32 %v859_v11 }
 0xd4d   :  { %v2053_v15 = vpop.eup %2052 }
 0xd4e   :  { %863 = vrot.lane.b32.xlu1 %v2053_v15, %s2304_s3 }
 0xdc0   :  { %v864_v16 = vpop.permute.xlu1 %863 }
 0xdc1   :  { %v866_v14 = vmul.f32 %v864_v16, %v861_v2 }
 0xdc3   :  { %v870_v1 = vadd.f32 %v869_v9, %v866_v14  ;;  %v179_v9 = vld [vmem:[#allocation10] sm:$0xff] }
 0xdc4   :  { %1069 = vmatpush.msra.mxu0 %v179_v9 }
 0xdc5   :  { %v872_v18 = vrot.slane %v870_v1, 4  ;;  %v958_v35 = vrot.slane %v870_v1, 6  ;;  %v2691_v1 = vld [vmem:[%s2905_s12] ss:$0 sm:$0xff] }
 0xdc7   :  { %875 = vrot.lane.b32.xlu2 %v872_v18, %s2304_s3  ;;  %v874_v17 = vadd.f32 %v872_v18, %v783_v44  ;;  %v192_v44 = vld [vmem:[#allocation7 + $0x18] sm:$0xff]  ;;  %v2006_v18 = vld [vmem:[%s2899_s6] ss:$0 sm:$0xff] }
 0xdc8   :  { %987 = vmatpush.msra.mxu2 %v192_v44 }
 0xdca   :  { %988 = vmatpush.msra.mxu2 %v191_v46 }
 0xdcc   :  { %989 = vmatpush.msra.mxu2 %v190_v48 }
 0xdce   :  { %990 = vmatpush.msra.mxu2 %v189_v51 }
 0xe21   :  { %v876_v7 = vpop.permute.xlu2 %875 }
 0xe22   :  { %1939 = vmatmul.msk.f32.vlgmr.msrb.gmra.mxu0 %vm207_vm0, %v876_v7  ;;  %1940 = vmatmul.msk.f32.vlgmr.msra.gmra.mxu1 %vm207_vm0, %v876_v7 }
 0xe23   :  { %1369 = vmatpush.msrb.mxu0 %v2645_v59 }
 0xe25   :  { %1370 = vmatpush.msrb.mxu0 %v2643_v58 }
 0xe27   :  { %1371 = vmatpush.msrb.mxu0 %v2651_v63 }
 0xe29   :  { %1372 = vmatpush.msrb.mxu0 %v2647_v61 }
 0xe2a   :  { %1096 = vmatmul.f32.vlgmr.msrb.gmra.mxu1 %v2303_v12 }
 0xe9f   :  { %v896_v5 = vpop.f32.mrf.mxu0  ;;  %v916_v28 = vpop.f32.mrf.mxu1 }
 0xea0   :  { %v897_v21 = vadd.f32 %v2487_v13, %v896_v5  ;;  %v917_v31 = vadd.f32 %v916_v28, %v2534_v36 }
 0xea2   :  { %v920_v19 = vrot.slane %v897_v21, 2  ;;  %v943_v38 = vrot.slane %v917_v31, 2 }
 0xea4   :  { %v922_v6 = vadd.f32 %v920_v19, %v2606_v43 }
 0xea6   :  { %v1941_v22 = vmul.f32 -1.442695, %v922_v6 }
 0xea8   :  { %2054 = vpow2.f32 %v1941_v22 }
 0xeae   :  { %v2055_v24 = vpop.eup %2054 }
 0xeaf   :  { %v926_v25 = vadd.f32 1.0, %v2055_v24 }
 0xeb1   :  { %2056 = vrcp.f32 %v926_v25  ;;  %v938_v30 = vand.u32 2147483648, %v926_v25  ;;  %v936_v33 = vand.u32 2147483647, %v926_v25  ;;  %vm932_vm15 = vweird.f32 %v926_v25 }
 0xeb3   :  { %v939_v13 = vor.u32 1.1754944e-38, %v938_v30  ;;  %vm937_vm2 = vcmp.eq.f32.partialorder %v936_v33, 8.507059e+37 }
 0xeb7   :  { %v2057_v26 = vpop.eup %2056 }
 0xeb8   :  { %v928_v27 = vmul.f32 %v2057_v26, %v926_v25  ;;  %vm933_vm14 = vweird.f32 %v2057_v26 }
 0xeb9   :  { %vm934_vm1 = vmor %vm932_vm15, %vm933_vm14 }
 0xeba   :  { %v929_v29 = vsub.f32 1.0, %v928_v27 }
 0xebc   :  { %v930_v32 = vmul.f32 %v2057_v26, %v929_v29 }
 0xebe   :  { %v931_v34 = vadd.f32 %v2057_v26, %v930_v32  ;;  %v2116_v32 = vld [vmem:[#allocation3] sm:$0xff] }
 0xec0   :  { %v935_v37 = vsel %vm934_vm1, %v2057_v26, %v931_v34 }
 0xec1   :  { %v940_v39 = vsel %vm937_vm2, %v939_v13, %v935_v37 }
 0xec2   :  { %v945_v40 = vmul.f32 %v943_v38, %v940_v39  ;;  %v960_v41 = vmul.f32 %v958_v35, %v940_v39  ;;  %v1097_v38 = vpop.f32.mrf.mxu1 }
 0xec4   :  { %947 = vrot.lane.b32.xlu0 %v945_v40, %s2302_s0  ;;  %v1098_v40 = vadd.f32 %v2691_v1, %v1097_v38 }
 0xecc   :  { %1995 = vrot.lane.b32.xlu0 %v1994_v62, %s2302_s0 }
 0xf36   :  { %v948_v42 = vpop.permute.xlu0 %947 }
 0xf37   :  { %v950_v23 = vadd.f32 %v948_v42, %v2606_v43  ;;  %v952_v43 = vsub.f32 1.0, %v940_v39  ;;  %v2744_v39 = vld [vmem:[%s2904_s11] ss:$0 sm:$0xff] }
 0xf39   :  { %2058 = vtanh.f32 %v950_v23 }
 0xf3e   :  { %v1996_v10 = vpop.permute.xlu0 %1995 }
 0xf3f   :  { %v2059_v36 = vpop.eup %2058  ;;  %v2668_v15 = vunpack.i.h.bf16 %v1996_v10  ;;  %v2670_v2 = vunpack.i.l.bf16 %v1996_v10 }
 0xf40   :  { %954 = vrot.lane.b32.xlu1 %v2059_v36, %s2304_s3 }
 0xf41   :  { %1211 = vmatpush.msra.mxu1 %v2670_v2  ;;  %1131 = vmatpush.msrb.mxu2 %v2670_v2 }
 0xf43   :  { %1212 = vmatpush.msra.mxu1 %v2668_v15  ;;  %1132 = vmatpush.msrb.mxu2 %v2668_v15 }
 0xf48   :  { %2000 = vrot.lane.b32.xlu1 %v1999_v0, %s2302_s0 }
 0xfb2   :  { %v955_v53 = vpop.permute.xlu1 %954 }
 0xfb3   :  { %v957_v54 = vmul.f32 %v955_v53, %v952_v43 }
 0xfb5   :  { %v961_v55 = vadd.f32 %v960_v41, %v957_v54 }
 0xfb7   :  { %v963_v56 = vrot.slane %v961_v55, 6 }
 0xfb9   :  { %v965_v20 = vadd.f32 %v963_v56, %v874_v17 }
 0xfba   :  { %v2001_v11 = vpop.permute.xlu1 %2000 }
 0xfbb   :  { %v966_v57 = vmul.f32 0.125, %v965_v20  ;;  %v2674_v16 = vunpack.i.l.bf16 %v2001_v11  ;;  %v2679_v14 = vunpack.i.h.bf16 %v2001_v11 }
 0xfbd   :  { %971 = vrot.lane.b32.xlu2 %v966_v57, %s2304_s3  ;;  %1213 = vmatpush.msra.mxu1 %v2674_v16 }
 0xfbe   :  { %1133 = vmatpush.msrb.mxu2 %v2674_v16 }
 0xfbf   :  { %1214 = vmatpush.msra.mxu1 %v2679_v14 }
 0xfc0   :  { %1134 = vmatpush.msrb.mxu2 %v2679_v14 }
 0xfc1   :  { %1389 = vmatpush.msrb.mxu1 %v2670_v2 }
 0xfc3   :  { %1390 = vmatpush.msrb.mxu1 %v2668_v15 }
 0xfc5   :  { %1116 = vrot.lane.b32.xlu2 %v2691_v1, %s2302_s0  ;;  %1391 = vmatpush.msrb.mxu1 %v2674_v16 }
 0xfc7   :  { %1392 = vmatpush.msrb.mxu1 %v2679_v14 }
0x1017   :  { %v972_v3 = vpop.permute.xlu2 %971 }
0x1018   :  { %1942 = vmatmul.msk.f32.vlgmr.msra.gmra.mxu2 %vm207_vm0, %v972_v3  ;;  %1943 = vmatmul.msk.f32.vlgmr.msra.gmra.mxu3 %vm207_vm0, %v972_v3 }
0x1019   :  { %1300 = vmatpush.msra.mxu3 %v2670_v2  ;;  %1280 = vmatpush.msra.mxu2 %v2645_v59 }
0x101b   :  { %1301 = vmatpush.msra.mxu3 %v2668_v15  ;;  %1281 = vmatpush.msra.mxu2 %v2643_v58 }
0x101d   :  { %1302 = vmatpush.msra.mxu3 %v2674_v16  ;;  %1282 = vmatpush.msra.mxu2 %v2651_v63 }
0x101f   :  { %1303 = vmatpush.msra.mxu3 %v2679_v14  ;;  %1283 = vmatpush.msra.mxu2 %v2647_v61  ;;  %v2751_v49 = vpop.permute.xlu2 %1116 }
0x1020   :  { %1135 = vmatmul.f32.vlgmr.msrb.gmra.mxu2 %v2303_v12  ;;  %v2007_v12 = vld [vmem:[%s2901_s8] ss:$0 sm:$0xff] }
0x1021   :  { %1458 = vmatpush.msrb.mxu2 %v2645_v59 }
0x1023   :  { %1459 = vmatpush.msrb.mxu2 %v2643_v58 }
0x1025   :  { %1460 = vmatpush.msrb.mxu2 %v2651_v63 }
0x1027   :  { %1461 = vmatpush.msrb.mxu2 %v2647_v61 }
0x109b   :  { %v992_v17 = vpop.f32.mrf.mxu2  ;;  %v1015_v7 = vpop.f32.mrf.mxu3 }
0x109c   :  { %v993_v5 = vadd.f32 %v2006_v18, %v992_v17  ;;  %v1016_v21 = vadd.f32 %v2007_v12, %v1015_v7 }
0x109e   :  { %v1019_v19 = vrot.slane %v993_v5, 6  ;;  %v1021_v6 = vrot.slane %v993_v5, 4  ;;  %v1032_v22 = vrot.slane %v1016_v21, 6  ;;  %v1034_v24 = vrot.slane %v1016_v21, 4 }
0x109f   :  { %v1023_v25 = vrot.slane %v993_v5, 2  ;;  %v1036_v31 = vrot.slane %v1016_v21, 2 }
0x10a0   :  { %v1026_v26 = vsel %vm1025_vm3, %v993_v5, %v1019_v19  ;;  %v1038_v27 = vsel %vm1025_vm3, %v1016_v21, %v1032_v22 }
0x10a1   :  { %v1028_v28 = vsel %vm1027_vm4, %v1026_v26, %v1021_v6  ;;  %v1039_v29 = vsel %vm1027_vm4, %v1038_v27, %v1034_v24 }
0x10a2   :  { %v2723_v30 = vsel %vm1029_vm5, %v1028_v28, %v1023_v25  ;;  %v1040_v34 = vsel %vm1029_vm5, %v1039_v29, %v1036_v31 }
0x10a3   :  { %v1041_v33 = vmul.f32 %v2116_v32, %v2723_v30  ;;  %v1042_v35 = vmul.f32 %v2723_v30, %v2578_v60  ;;  %v1136_v48 = vpop.f32.mrf.mxu2 }
0x10a4   :  { %v1137_v53 = vadd.f32 %v1136_v48, %v2751_v49 }
0x10a5   :  { %v2727_v13 = vadd.f32 %v1041_v33, %v1040_v34  ;;  %v2736_v37 = vadd.f32 %v1042_v35, %v1040_v34 }
0x10a7   :  { %1944 = vmatmul.msk.f32.vlgmr.msra.gmra.mxu0 %vm207_vm0, %v2727_v13 }
0x10a8   :  { %1539 = vmatpush.msra.mxu0 %v2645_v59 }
0x10aa   :  { %1540 = vmatpush.msra.mxu0 %v2643_v58 }
0x10ac   :  { %1541 = vmatpush.msra.mxu0 %v2651_v63 }
0x10ae   :  { %1542 = vmatpush.msra.mxu0 %v2647_v61 }
0x10af   :  { %1945 = vmatmul.msk.f32.gmra.mxu0 %vm207_vm0, %v2736_v37 }
0x1124   :  { %v1071_v60 = vpop.f32.mrf.mxu0 }
0x1125   :  { %v2748_v41 = vadd.f32 %v2744_v39, %v1071_v60 }
0x1127   :  { %v1139_v42 = vadd.f32 %v1098_v40, %v2748_v41 }
0x1129   :  { %v1946_v23 = vmul.f32 -1.442695, %v1139_v42 }
0x112b   :  { %2060 = vpow2.f32 %v1946_v23 }
0x1131   :  { %v2061_v36 = vpop.eup %2060 }
0x1132   :  { %v1143_v44 = vadd.f32 1.0, %v2061_v36 }
0x1134   :  { %2062 = vrcp.f32 %v1143_v44  ;;  %v1155_v51 = vand.u32 2147483648, %v1143_v44  ;;  %v1153_v43 = vand.u32 2147483647, %v1143_v44  ;;  %vm1149_vm7 = vweird.f32 %v1143_v44 }
0x1136   :  { %v1156_v55 = vor.u32 1.1754944e-38, %v1155_v51  ;;  %vm1154_vm9 = vcmp.eq.f32.partialorder %v1153_v43, 8.507059e+37 }
0x113a   :  { %v2063_v45 = vpop.eup %2062 }
0x113b   :  { %v1145_v46 = vmul.f32 %v2063_v45, %v1143_v44  ;;  %vm1150_vm6 = vweird.f32 %v2063_v45 }
0x113c   :  { %vm1151_vm8 = vmor %vm1149_vm7, %vm1150_vm6 }
0x113d   :  { %v1146_v47 = vsub.f32 1.0, %v1145_v46 }
0x113f   :  { %v1147_v52 = vmul.f32 %v2063_v45, %v1146_v47 }
0x1141   :  { %v1148_v54 = vadd.f32 %v2063_v45, %v1147_v52 }
0x1143   :  { %v1152_v56 = vsel %vm1151_vm8, %v2063_v45, %v1148_v54 }
0x1144   :  { %v1157_v20 = vsel %vm1154_vm9, %v1156_v55, %v1152_v56 }
0x1145   :  { %v1159_v57 = vmul.f32 %v1157_v20, %v1137_v53  ;;  %v1166_v4 = vsub.f32 1.0, %v1157_v20  ;;  %v1172_v50 = vmul.f32 0.0, %v1157_v20 }
0x1147   :  { %1161 = vrot.lane.b32.xlu0 %v1159_v57, %s2302_s0 }
0x11b9   :  { %v1162_v62 = vpop.permute.xlu0 %1161 }
0x11ba   :  { %v1164_v0 = vadd.f32 %v1162_v62, %v2748_v41 }
0x11bc   :  { %2064 = vtanh.f32 %v1164_v0 }
0x11c2   :  { %v2065_v3 = vpop.eup %2064 }
0x11c3   :  { %1168 = vrot.lane.b32.xlu1 %v2065_v3, %s2304_s3 }
0x1235   :  { %v1169_v8 = vpop.permute.xlu1 %1168 }
0x1236   :  { %v1171_v9 = vmul.f32 %v1169_v8, %v1166_v4 }
0x1238   :  { %v2757_v10 = vadd.f32 %v1172_v50, %v1171_v9 }
0x123a   :  { %1175 = vrot.lane.b32.xlu2 %v2757_v10, %s2304_s3  ;;  %v1258_v36 = vrot.slane %v2757_v10, 6 }
0x1294   :  { %v1176_v11 = vpop.permute.xlu2 %1175 }
0x1295   :  { %1947 = vmatmul.msk.f32.vlgmr.msrb.gmra.mxu3 %vm207_vm0, %v1176_v11  ;;  %1948 = vmatmul.msk.f32.vlgmr.msra.gmra.mxu1 %vm207_vm0, %v1176_v11 }
0x1296   :  { %1478 = vmatpush.msrb.mxu3 %v2670_v2  ;;  %1559 = vmatpush.msra.mxu1 %v2670_v2 }
0x1298   :  { %1479 = vmatpush.msrb.mxu3 %v2668_v15  ;;  %1560 = vmatpush.msra.mxu1 %v2668_v15 }
0x129a   :  { %1480 = vmatpush.msrb.mxu3 %v2674_v16  ;;  %1561 = vmatpush.msra.mxu1 %v2674_v16 }
0x129c   :  { %1481 = vmatpush.msrb.mxu3 %v2679_v14  ;;  %1562 = vmatpush.msra.mxu1 %v2679_v14 }
0x1312   :  { %v1216_v24 = vpop.f32.mrf.mxu1 }
0x1313   :  { %v1217_v27 = vadd.f32 %v1216_v24, %v2751_v49 }
0x1315   :  { %v1243_v33 = vrot.slane %v1217_v27, 6 }
0x1318   :  { %v1196_v18 = vpop.f32.mrf.mxu3 }
0x1319   :  { %v1197_v12 = vadd.f32 %v2691_v1, %v1196_v18 }
0x131b   :  { %v1220_v17 = vrot.slane %v1197_v12, 6 }
0x131d   :  { %v1222_v7 = vadd.f32 %v1220_v17, %v2748_v41 }
0x131f   :  { %v1949_v5 = vmul.f32 -1.442695, %v1222_v7 }
0x1321   :  { %2066 = vpow2.f32 %v1949_v5 }
0x1327   :  { %v2067_v21 = vpop.eup %2066 }
0x1328   :  { %v1226_v19 = vadd.f32 1.0, %v2067_v21 }
0x132a   :  { %2068 = vrcp.f32 %v1226_v19  ;;  %v1238_v26 = vand.u32 2147483648, %v1226_v19  ;;  %v1236_v29 = vand.u32 2147483647, %v1226_v19  ;;  %vm1232_vm11 = vweird.f32 %v1226_v19 }
0x132c   :  { %v1239_v32 = vor.u32 1.1754944e-38, %v1238_v26  ;;  %vm1237_vm13 = vcmp.eq.f32.partialorder %v1236_v29, 8.507059e+37 }
0x1330   :  { %v2069_v6 = vpop.eup %2068 }
0x1331   :  { %v1228_v22 = vmul.f32 %v2069_v6, %v1226_v19  ;;  %vm1233_vm10 = vweird.f32 %v2069_v6 }
0x1332   :  { %vm1234_vm12 = vmor %vm1232_vm11, %vm1233_vm10 }
0x1333   :  { %v1229_v25 = vsub.f32 1.0, %v1228_v22 }
0x1335   :  { %v1230_v28 = vmul.f32 %v2069_v6, %v1229_v25 }
0x1337   :  { %v1231_v31 = vadd.f32 %v2069_v6, %v1230_v28 }
0x1339   :  { %v1235_v34 = vsel %vm1234_vm12, %v2069_v6, %v1231_v31 }
0x133a   :  { %v1240_v35 = vsel %vm1237_vm13, %v1239_v32, %v1235_v34 }
0x133b   :  { %v1245_v38 = vmul.f32 %v1243_v33, %v1240_v35  ;;  %v1252_v23 = vsub.f32 1.0, %v1240_v35  ;;  %v1260_v46 = vmul.f32 %v1258_v36, %v1240_v35 }
0x133d   :  { %1247 = vrot.lane.b32.xlu0 %v1245_v38, %s2302_s0 }
0x13af   :  { %v1248_v40 = vpop.permute.xlu0 %1247 }
0x13b0   :  { %v1250_v60 = vadd.f32 %v1248_v40, %v2748_v41 }
0x13b2   :  { %2070 = vtanh.f32 %v1250_v60 }
0x13b8   :  { %v2071_v42 = vpop.eup %2070 }
0x13b9   :  { %1254 = vrot.lane.b32.xlu1 %v2071_v42, %s2304_s3 }
0x142b   :  { %v1255_v44 = vpop.permute.xlu1 %1254 }
0x142c   :  { %v1257_v45 = vmul.f32 %v1255_v44, %v1252_v23 }
0x142e   :  { %v1261_v47 = vadd.f32 %v1260_v46, %v1257_v45 }
0x1430   :  { %v1263_v48 = vrot.slane %v1261_v47, 2  ;;  %v1347_v7 = vrot.slane %v1261_v47, 6  ;;  %v1788_v29 = vsel %vm1025_vm3, %v2757_v10, %v1261_v47  ;;  %v1074_v10 = vpop.f32.mrf.mxu0 }
0x1432   :  { %1264 = vrot.lane.b32.xlu2 %v1263_v48, %s2304_s3 }
0x148c   :  { %v1265_v51 = vpop.permute.xlu2 %1264 }
0x148d   :  { %1950 = vmatmul.msk.f32.vlgmr.msra.gmra.mxu2 %vm207_vm0, %v1265_v51  ;;  %1951 = vmatmul.msk.f32.vlgmr.msra.gmra.mxu3 %vm207_vm0, %v1265_v51 }
0x148e   :  { %1648 = vmatpush.msra.mxu3 %v2670_v2  ;;  %1628 = vmatpush.msra.mxu2 %v2645_v59 }
0x1490   :  { %1649 = vmatpush.msra.mxu3 %v2668_v15  ;;  %1629 = vmatpush.msra.mxu2 %v2643_v58 }
0x1492   :  { %1650 = vmatpush.msra.mxu3 %v2674_v16  ;;  %1630 = vmatpush.msra.mxu2 %v2651_v63 }
0x1494   :  { %1651 = vmatpush.msra.mxu3 %v2679_v14  ;;  %1631 = vmatpush.msra.mxu2 %v2647_v61 }
0x1510   :  { %v1285_v52 = vpop.f32.mrf.mxu2  ;;  %v1305_v0 = vpop.f32.mrf.mxu3 }
0x1511   :  { %v1286_v43 = vadd.f32 %v2691_v1, %v1285_v52  ;;  %v1306_v8 = vadd.f32 %v1305_v0, %v2751_v49 }
0x1513   :  { %v1309_v53 = vrot.slane %v1286_v43, 4  ;;  %v1332_v17 = vrot.slane %v1306_v8, 4 }
0x1515   :  { %v1311_v54 = vadd.f32 %v1309_v53, %v2748_v41 }
0x1517   :  { %v1952_v55 = vmul.f32 -1.442695, %v1311_v54 }
0x1519   :  { %2072 = vpow2.f32 %v1952_v55 }
0x151f   :  { %v2073_v56 = vpop.eup %2072 }
0x1520   :  { %v1315_v20 = vadd.f32 1.0, %v2073_v56 }
0x1522   :  { %2074 = vrcp.f32 %v1315_v20  ;;  %v1327_v4 = vand.u32 2147483648, %v1315_v20  ;;  %v1325_v9 = vand.u32 2147483647, %v1315_v20  ;;  %vm1321_vm15 = vweird.f32 %v1315_v20 }
0x1524   :  { %v1328_v18 = vor.u32 1.1754944e-38, %v1327_v4  ;;  %vm1326_vm2 = vcmp.eq.f32.partialorder %v1325_v9, 8.507059e+37  ;;  %v2822_v4 = vadd.f32 %v2744_v39, %v1074_v10 }
0x1528   :  { %v2075_v57 = vpop.eup %2074 }
0x1529   :  { %v1317_v62 = vmul.f32 %v2075_v57, %v1315_v20  ;;  %vm1322_vm14 = vweird.f32 %v2075_v57 }
0x152a   :  { %vm1323_vm1 = vmor %vm1321_vm15, %vm1322_vm14 }
0x152b   :  { %v1318_v3 = vsub.f32 1.0, %v1317_v62 }
0x152d   :  { %v1319_v50 = vmul.f32 %v2075_v57, %v1318_v3 }
0x152f   :  { %v1320_v11 = vadd.f32 %v2075_v57, %v1319_v50 }
0x1531   :  { %v1324_v12 = vsel %vm1323_vm1, %v2075_v57, %v1320_v11 }
0x1532   :  { %v1329_v5 = vsel %vm1326_vm2, %v1328_v18, %v1324_v12 }
0x1533   :  { %v1334_v21 = vmul.f32 %v1332_v17, %v1329_v5  ;;  %v1349_v19 = vmul.f32 %v1347_v7, %v1329_v5  ;;  %v1341_v25 = vsub.f32 1.0, %v1329_v5 }
0x1535   :  { %1336 = vrot.lane.b32.xlu0 %v1334_v21, %s2302_s0 }
0x15a7   :  { %v1337_v6 = vpop.permute.xlu0 %1336 }
0x15a8   :  { %v1339_v22 = vadd.f32 %v1337_v6, %v2748_v41 }
0x15aa   :  { %2076 = vtanh.f32 %v1339_v22 }
0x15b0   :  { %v2077_v24 = vpop.eup %2076 }
0x15b1   :  { %1343 = vrot.lane.b32.xlu1 %v2077_v24, %s2304_s3 }
0x1623   :  { %v1344_v26 = vpop.permute.xlu1 %1343 }
0x1624   :  { %v1346_v27 = vmul.f32 %v1344_v26, %v1341_v25 }
0x1626   :  { %v1350_v28 = vadd.f32 %v1349_v19, %v1346_v27 }
0x1628   :  { %v1352_v31 = vrot.slane %v1350_v28, 4  ;;  %v1789_v32 = vsel %vm1027_vm4, %v1788_v29, %v1350_v28  ;;  %v1436_v47 = vrot.slane %v1350_v28, 6 }
0x162a   :  { %1353 = vrot.lane.b32.xlu2 %v1352_v31, %s2304_s3 }
0x1684   :  { %v1354_v33 = vpop.permute.xlu2 %1353 }
0x1685   :  { %1953 = vmatmul.msk.f32.vlgmr.msrb.gmra.mxu0 %vm207_vm0, %v1354_v33  ;;  %1954 = vmatmul.msk.f32.vlgmr.msrb.gmra.mxu1 %vm207_vm0, %v1354_v33 }
0x1686   :  { %1737 = vmatpush.msrb.mxu1 %v2670_v2  ;;  %1717 = vmatpush.msrb.mxu0 %v2645_v59 }
0x1688   :  { %1738 = vmatpush.msrb.mxu1 %v2668_v15  ;;  %1718 = vmatpush.msrb.mxu0 %v2643_v58 }
0x168a   :  { %1739 = vmatpush.msrb.mxu1 %v2674_v16  ;;  %1719 = vmatpush.msrb.mxu0 %v2651_v63 }
0x168c   :  { %1740 = vmatpush.msrb.mxu1 %v2679_v14  ;;  %1720 = vmatpush.msrb.mxu0 %v2647_v61 }
0x1702   :  { %v1374_v34 = vpop.f32.mrf.mxu0  ;;  %v1394_v60 = vpop.f32.mrf.mxu1 }
0x1703   :  { %v1375_v35 = vadd.f32 %v2691_v1, %v1374_v34  ;;  %v1395_v14 = vadd.f32 %v1394_v60, %v2751_v49 }
0x1705   :  { %v1398_v38 = vrot.slane %v1375_v35, 2  ;;  %v1421_v46 = vrot.slane %v1395_v14, 2 }
0x1707   :  { %v1400_v2 = vadd.f32 %v1398_v38, %v2748_v41 }
0x1709   :  { %v1955_v59 = vmul.f32 -1.442695, %v1400_v2 }
0x170b   :  { %2078 = vpow2.f32 %v1955_v59 }
0x1711   :  { %v2079_v15 = vpop.eup %2078 }
0x1712   :  { %v1404_v40 = vadd.f32 1.0, %v2079_v15 }
0x1714   :  { %2080 = vrcp.f32 %v1404_v40  ;;  %v1416_v42 = vand.u32 2147483648, %v1404_v40  ;;  %v1414_v23 = vand.u32 2147483647, %v1404_v40  ;;  %vm1410_vm7 = vweird.f32 %v1404_v40 }
0x1716   :  { %v1417_v44 = vor.u32 1.1754944e-38, %v1416_v42  ;;  %vm1415_vm9 = vcmp.eq.f32.partialorder %v1414_v23, 8.507059e+37 }
0x171a   :  { %v2081_v58 = vpop.eup %2080 }
0x171b   :  { %v1406_v16 = vmul.f32 %v2081_v58, %v1404_v40  ;;  %vm1411_vm6 = vweird.f32 %v2081_v58 }
0x171c   :  { %vm1412_vm8 = vmor %vm1410_vm7, %vm1411_vm6 }
0x171d   :  { %v1407_v63 = vsub.f32 1.0, %v1406_v16 }
0x171f   :  { %v1408_v61 = vmul.f32 %v2081_v58, %v1407_v63 }
0x1721   :  { %v1409_v36 = vadd.f32 %v2081_v58, %v1408_v61 }
0x1723   :  { %v1413_v45 = vsel %vm1412_vm8, %v2081_v58, %v1409_v36 }
0x1724   :  { %v1418_v48 = vsel %vm1415_vm9, %v1417_v44, %v1413_v45 }
0x1725   :  { %v1423_v51 = vmul.f32 %v1421_v46, %v1418_v48  ;;  %v1438_v52 = vmul.f32 %v1436_v47, %v1418_v48  ;;  %v1430_v55 = vsub.f32 1.0, %v1418_v48 }
0x1727   :  { %1425 = vrot.lane.b32.xlu0 %v1423_v51, %s2302_s0 }
0x1799   :  { %v1426_v43 = vpop.permute.xlu0 %1425 }
0x179a   :  { %v1428_v53 = vadd.f32 %v1426_v43, %v2748_v41 }
0x179c   :  { %2082 = vtanh.f32 %v1428_v53 }
0x17a2   :  { %v2083_v54 = vpop.eup %2082 }
0x17a3   :  { %1432 = vrot.lane.b32.xlu1 %v2083_v54, %s2304_s3 }
0x1815   :  { %v1433_v56 = vpop.permute.xlu1 %1432 }
0x1816   :  { %v1435_v20 = vmul.f32 %v1433_v56, %v1430_v55 }
0x1818   :  { %v1439_v57 = vadd.f32 %v1438_v52, %v1435_v20 }
0x181a   :  { %v1441_v62 = vrot.slane %v1439_v57, 6  ;;  %v2816_v0 = vsel %vm1029_vm5, %v1789_v32, %v1439_v57 }
0x181c   :  { %1442 = vrot.lane.b32.xlu2 %v1441_v62, %s2304_s3 }
0x1876   :  { %v1443_v3 = vpop.permute.xlu2 %1442 }
0x1877   :  { %1956 = vmatmul.msk.f32.vlgmr.msrb.gmra.mxu2 %vm207_vm0, %v1443_v3  ;;  %1957 = vmatmul.msk.f32.vlgmr.msrb.gmra.mxu3 %vm207_vm0, %v1443_v3 }
0x18fa   :  { %v1463_v41 = vpop.f32.mrf.mxu2  ;;  %v1483_v6 = vpop.f32.mrf.mxu3 }
0x18fb   :  { %v1464_v8 = vadd.f32 %v2691_v1, %v1463_v41  ;;  %v1484_v24 = vadd.f32 %v1483_v6, %v2751_v49 }
0x18fd   :  { %v1486_v50 = vadd.f32 %v1464_v8, %v2822_v4 }
0x18ff   :  { %v1958_v9 = vmul.f32 -1.442695, %v1486_v50 }
0x1901   :  { %2084 = vpow2.f32 %v1958_v9 }
0x1907   :  { %v2085_v11 = vpop.eup %2084 }
0x1908   :  { %v1490_v18 = vadd.f32 1.0, %v2085_v11 }
0x190a   :  { %2086 = vrcp.f32 %v1490_v18  ;;  %v1502_v5 = vand.u32 2147483648, %v1490_v18  ;;  %v1500_v19 = vand.u32 2147483647, %v1490_v18  ;;  %vm1496_vm11 = vweird.f32 %v1490_v18 }
0x190c   :  { %v1503_v39 = vor.u32 1.1754944e-38, %v1502_v5  ;;  %vm1501_vm13 = vcmp.eq.f32.partialorder %v1500_v19, 8.507059e+37 }
0x1910   :  { %v2087_v12 = vpop.eup %2086 }
0x1911   :  { %v1492_v17 = vmul.f32 %v2087_v12, %v1490_v18  ;;  %vm1497_vm10 = vweird.f32 %v2087_v12 }
0x1912   :  { %vm1498_vm12 = vmor %vm1496_vm11, %vm1497_vm10 }
0x1913   :  { %v1493_v7 = vsub.f32 1.0, %v1492_v17 }
0x1915   :  { %v1494_v21 = vmul.f32 %v2087_v12, %v1493_v7 }
0x1917   :  { %v1495_v22 = vadd.f32 %v2087_v12, %v1494_v21 }
0x1919   :  { %v1499_v25 = vsel %vm1498_vm12, %v2087_v12, %v1495_v22 }
0x191a   :  { %v1504_v26 = vsel %vm1501_vm13, %v1503_v39, %v1499_v25 }
0x191b   :  { %v1506_v27 = vmul.f32 %v1504_v26, %v1484_v24  ;;  %v1513_v32 = vsub.f32 1.0, %v1504_v26  ;;  %v1520_v10 = vmul.f32 %v1504_v26, %v1441_v62 }
0x191d   :  { %1508 = vrot.lane.b32.xlu0 %v1506_v27, %s2302_s0 }
0x198f   :  { %v1509_v28 = vpop.permute.xlu0 %1508 }
0x1990   :  { %v1511_v29 = vadd.f32 %v1509_v28, %v2822_v4 }
0x1992   :  { %2088 = vtanh.f32 %v1511_v29 }
0x1998   :  { %v2089_v31 = vpop.eup %2088 }
0x1999   :  { %1515 = vrot.lane.b32.xlu1 %v2089_v31, %s2304_s3 }
0x1a0b   :  { %v1516_v33 = vpop.permute.xlu1 %1515 }
0x1a0c   :  { %v1518_v34 = vmul.f32 %v1516_v33, %v1513_v32 }
0x1a0e   :  { %v2830_v35 = vadd.f32 %v1520_v10, %v1518_v34 }
0x1a10   :  { %1523 = vrot.lane.b32.xlu2 %v2830_v35, %s2304_s3  ;;  %v1606_v20 = vrot.slane %v2830_v35, 6 }
0x1a6a   :  { %v1524_v38 = vpop.permute.xlu2 %1523 }
0x1a6b   :  { %1959 = vmatmul.msk.f32.vlgmr.msra.gmra.mxu0 %vm207_vm0, %v1524_v38  ;;  %1960 = vmatmul.msk.f32.vlgmr.msra.gmra.mxu1 %vm207_vm0, %v1524_v38 }
0x1ae8   :  { %v1544_v2 = vpop.f32.mrf.mxu0  ;;  %v1564_v14 = vpop.f32.mrf.mxu1 }
0x1ae9   :  { %v1545_v59 = vadd.f32 %v2691_v1, %v1544_v2  ;;  %v1565_v36 = vadd.f32 %v1564_v14, %v2751_v49  ;;  %v202_v14 = vld [vmem:[#allocation13 + $0x18] sm:$0xff] }
0x1aea   :  { %1819 = vmatpush.msrb.mxu2 %v202_v14 }
0x1aeb   :  { %v1568_v15 = vrot.slane %v1545_v59, 6  ;;  %v1591_v51 = vrot.slane %v1565_v36, 6  ;;  %v199_v36 = vld [vmem:[#allocation13] sm:$0xff] }
0x1aed   :  { %v1570_v40 = vadd.f32 %v1568_v15, %v2822_v4 }
0x1aef   :  { %v1961_v58 = vmul.f32 -1.442695, %v1570_v40 }
0x1af1   :  { %2090 = vpow2.f32 %v1961_v58 }
0x1af7   :  { %v2091_v16 = vpop.eup %2090 }
0x1af8   :  { %v1574_v60 = vadd.f32 1.0, %v2091_v16 }
0x1afa   :  { %2092 = vrcp.f32 %v1574_v60  ;;  %v1586_v23 = vand.u32 2147483648, %v1574_v60  ;;  %v1584_v45 = vand.u32 2147483647, %v1574_v60  ;;  %vm1580_vm15 = vweird.f32 %v1574_v60 }
0x1afc   :  { %v1587_v47 = vor.u32 1.1754944e-38, %v1586_v23  ;;  %vm1585_vm2 = vcmp.eq.f32.partialorder %v1584_v45, 8.507059e+37  ;;  %v200_v23 = vld [vmem:[#allocation13 + $0x8] sm:$0xff] }
0x1b00   :  { %v2093_v63 = vpop.eup %2092 }
0x1b01   :  { %v1576_v42 = vmul.f32 %v2093_v63, %v1574_v60  ;;  %vm1581_vm14 = vweird.f32 %v2093_v63 }
0x1b02   :  { %vm1582_vm1 = vmor %vm1580_vm15, %vm1581_vm14 }
0x1b03   :  { %v1577_v61 = vsub.f32 1.0, %v1576_v42 }
0x1b05   :  { %v1578_v44 = vmul.f32 %v2093_v63, %v1577_v61  ;;  %v201_v61 = vld [vmem:[#allocation13 + $0x10] sm:$0xff] }
0x1b06   :  { %1820 = vmatpush.msrb.mxu2 %v201_v61 }
0x1b07   :  { %v1579_v46 = vadd.f32 %v2093_v63, %v1578_v44 }
0x1b08   :  { %1821 = vmatpush.msrb.mxu2 %v200_v23 }
0x1b09   :  { %v1583_v48 = vsel %vm1582_vm1, %v2093_v63, %v1579_v46 }
0x1b0a   :  { %v1588_v52 = vsel %vm1585_vm2, %v1587_v47, %v1583_v48  ;;  %1822 = vmatpush.msrb.mxu2 %v199_v36 }
0x1b0b   :  { %v1593_v43 = vmul.f32 %v1591_v51, %v1588_v52  ;;  %v1600_v56 = vsub.f32 1.0, %v1588_v52  ;;  %v1608_v3 = vmul.f32 %v1606_v20, %v1588_v52 }
0x1b0d   :  { %1595 = vrot.lane.b32.xlu0 %v1593_v43, %s2302_s0 }
0x1b7f   :  { %v1596_v53 = vpop.permute.xlu0 %1595 }
0x1b80   :  { %v1598_v54 = vadd.f32 %v1596_v53, %v2822_v4 }
0x1b82   :  { %2094 = vtanh.f32 %v1598_v54 }
0x1b88   :  { %v2095_v55 = vpop.eup %2094 }
0x1b89   :  { %1602 = vrot.lane.b32.xlu1 %v2095_v55, %s2304_s3 }
0x1bfb   :  { %v1603_v57 = vpop.permute.xlu1 %1602 }
0x1bfc   :  { %v1605_v62 = vmul.f32 %v1603_v57, %v1600_v56 }
0x1bfe   :  { %v1609_v41 = vadd.f32 %v1608_v3, %v1605_v62 }
0x1c00   :  { %v1611_v8 = vrot.slane %v1609_v41, 2  ;;  %v1695_v32 = vrot.slane %v1609_v41, 6  ;;  %v1791_v60 = vsel %vm1025_vm3, %v2830_v35, %v1609_v41 }
0x1c02   :  { %1612 = vrot.lane.b32.xlu2 %v1611_v8, %s2304_s3 }
0x1c5c   :  { %v1613_v50 = vpop.permute.xlu2 %1612 }
0x1c5d   :  { %1962 = vmatmul.msk.f32.vlgmr.msra.gmra.mxu2 %vm207_vm0, %v1613_v50  ;;  %1963 = vmatmul.msk.f32.vlgmr.msra.gmra.mxu3 %vm207_vm0, %v1613_v50 }
0x1ce0   :  { %v1633_v9 = vpop.f32.mrf.mxu2  ;;  %v1653_v6 = vpop.f32.mrf.mxu3 }
0x1ce1   :  { %v1634_v11 = vadd.f32 %v2691_v1, %v1633_v9  ;;  %v1654_v24 = vadd.f32 %v1653_v6, %v2751_v49 }
0x1ce3   :  { %v1657_v18 = vrot.slane %v1634_v11, 4  ;;  %v1680_v31 = vrot.slane %v1654_v24, 4 }
0x1ce5   :  { %v1659_v12 = vadd.f32 %v1657_v18, %v2822_v4 }
0x1ce7   :  { %v1964_v17 = vmul.f32 -1.442695, %v1659_v12 }
0x1ce9   :  { %2096 = vpow2.f32 %v1964_v17 }
0x1cef   :  { %v2097_v7 = vpop.eup %2096 }
0x1cf0   :  { %v1663_v5 = vadd.f32 1.0, %v2097_v7 }
0x1cf2   :  { %2098 = vrcp.f32 %v1663_v5  ;;  %v1675_v39 = vand.u32 2147483648, %v1663_v5  ;;  %v1673_v26 = vand.u32 2147483647, %v1663_v5  ;;  %vm1669_vm7 = vweird.f32 %v1663_v5 }
0x1cf4   :  { %v1676_v28 = vor.u32 1.1754944e-38, %v1675_v39  ;;  %vm1674_vm9 = vcmp.eq.f32.partialorder %v1673_v26, 8.507059e+37  ;;  %v2010_v39 = vld [vmem:[%s2907_s14] ss:$0 sm:$0xff]  ;;  %v1860_v26 = vld [vmem:[%s2908_s15 + $0x10] sm:$0xff] }
0x1cf8   :  { %v2099_v21 = vpop.eup %2098 }
0x1cf9   :  { %v1665_v19 = vmul.f32 %v2099_v21, %v1663_v5  ;;  %vm1670_vm6 = vweird.f32 %v2099_v21 }
0x1cfa   :  { %vm1671_vm8 = vmor %vm1669_vm7, %vm1670_vm6 }
0x1cfb   :  { %v1666_v22 = vsub.f32 1.0, %v1665_v19 }
0x1cfd   :  { %v1667_v25 = vmul.f32 %v2099_v21, %v1666_v22 }
0x1cff   :  { %v1668_v27 = vadd.f32 %v2099_v21, %v1667_v25  ;;  %v1861_v25 = vld [vmem:[%s2908_s15 + $0x18] sm:$0xff] }
0x1d00   :  { %1881 = vmatpush.msrb.mxu3 %v1861_v25 }
0x1d01   :  { %v1672_v29 = vsel %vm1671_vm8, %v2099_v21, %v1668_v27  ;;  %v1859_v27 = vld [vmem:[%s2908_s15 + $0x8] sm:$0xff] }
0x1d02   :  { %v1677_v33 = vsel %vm1674_vm9, %v1676_v28, %v1672_v29  ;;  %1882 = vmatpush.msrb.mxu3 %v1860_v26  ;;  %v1858_v28 = vld [vmem:[%s2908_s15] sm:$0xff] }
0x1d03   :  { %v1682_v10 = vmul.f32 %v1680_v31, %v1677_v33  ;;  %v1697_v34 = vmul.f32 %v1695_v32, %v1677_v33  ;;  %v1689_v15 = vsub.f32 1.0, %v1677_v33 }
0x1d04   :  { %1883 = vmatpush.msrb.mxu3 %v1859_v27 }
0x1d05   :  { %1684 = vrot.lane.b32.xlu0 %v1682_v10, %s2302_s0 }
0x1d06   :  { %1884 = vmatpush.msrb.mxu3 %v1858_v28 }
0x1d77   :  { %v1685_v38 = vpop.permute.xlu0 %1684 }
0x1d78   :  { %v1687_v2 = vadd.f32 %v1685_v38, %v2822_v4 }
0x1d7a   :  { %2100 = vtanh.f32 %v1687_v2 }
0x1d80   :  { %v2101_v59 = vpop.eup %2100 }
0x1d81   :  { %1691 = vrot.lane.b32.xlu1 %v2101_v59, %s2304_s3 }
0x1df3   :  { %v1692_v40 = vpop.permute.xlu1 %1691 }
0x1df4   :  { %v1694_v58 = vmul.f32 %v1692_v40, %v1689_v15 }
0x1df6   :  { %v1698_v16 = vadd.f32 %v1697_v34, %v1694_v58 }
0x1df8   :  { %v1700_v63 = vrot.slane %v1698_v16, 4  ;;  %v1792_v42 = vsel %vm1027_vm4, %v1791_v60, %v1698_v16  ;;  %v1784_v50 = vrot.slane %v1698_v16, 6 }
0x1dfa   :  { %1701 = vrot.lane.b32.xlu2 %v1700_v63, %s2304_s3 }
0x1e02   :  { %1799 = vrot.lane.b32.xlu2 %v2816_v0, %s2304_s3 }
0x1e54   :  { %v1702_v44 = vpop.permute.xlu2 %1701 }
0x1e55   :  { %1965 = vmatmul.msk.f32.vlgmr.msrb.gmra.mxu0 %vm207_vm0, %v1702_v44  ;;  %1966 = vmatmul.msk.f32.vlgmr.msrb.gmra.mxu1 %vm207_vm0, %v1702_v44  ;;  %v2011_v44 = vld [vmem:[#allocation2] ss:$0 sm:$0xff] }
0x1e5c   :  { %v1800_v35 = vpop.permute.xlu2 %1799 }
0x1e5d   :  { %1968 = vmatmul.msk.f32.vlgmr.msrb.gmra.mxu2 %vm207_vm0, %v1800_v35 }
0x1ed2   :  { %v1722_v45 = vpop.f32.mrf.mxu0  ;;  %v1742_v54 = vpop.f32.mrf.mxu1 }
0x1ed3   :  { %v1723_v46 = vadd.f32 %v2691_v1, %v1722_v45  ;;  %v1743_v20 = vadd.f32 %v1742_v54, %v2751_v49 }
0x1ed5   :  { %v1746_v0 = vrot.slane %v1723_v46, 2  ;;  %v1769_v8 = vrot.slane %v1743_v20, 2 }
0x1ed7   :  { %v1748_v47 = vadd.f32 %v1746_v0, %v2822_v4 }
0x1ed9   :  { %v1967_v48 = vmul.f32 -1.442695, %v1748_v47 }
0x1edb   :  { %2102 = vpow2.f32 %v1967_v48 }
0x1ee1   :  { %v2103_v51 = vpop.eup %2102 }
0x1ee2   :  { %v1752_v52 = vadd.f32 1.0, %v2103_v51 }
0x1ee4   :  { %2104 = vrcp.f32 %v1752_v52  ;;  %v1764_v56 = vand.u32 2147483648, %v1752_v52  ;;  %v1762_v62 = vand.u32 2147483647, %v1752_v52  ;;  %vm1758_vm4 = vweird.f32 %v1752_v52 }
0x1ee6   :  { %v1765_v1 = vor.u32 1.1754944e-38, %v1764_v56  ;;  %vm1763_vm11 = vcmp.eq.f32.partialorder %v1762_v62, 8.507059e+37 }
0x1eea   :  { %v2105_v43 = vpop.eup %2104 }
0x1eeb   :  { %v1754_v53 = vmul.f32 %v2105_v43, %v1752_v52  ;;  %vm1759_vm3 = vweird.f32 %v2105_v43 }
0x1eec   :  { %vm1760_vm10 = vmor %vm1758_vm4, %vm1759_vm3 }
0x1eed   :  { %v1755_v55 = vsub.f32 1.0, %v1754_v53 }
0x1eef   :  { %v1756_v57 = vmul.f32 %v2105_v43, %v1755_v55 }
0x1ef1   :  { %v1757_v3 = vadd.f32 %v2105_v43, %v1756_v57 }
0x1ef3   :  { %v1761_v41 = vsel %vm1760_vm10, %v2105_v43, %v1757_v3 }
0x1ef4   :  { %v1766_v9 = vsel %vm1763_vm11, %v1765_v1, %v1761_v41 }
0x1ef5   :  { %v1771_v11 = vmul.f32 %v1769_v8, %v1766_v9  ;;  %v1786_v18 = vmul.f32 %v1784_v50, %v1766_v9  ;;  %v1778_v7 = vsub.f32 1.0, %v1766_v9 }
0x1ef7   :  { %1773 = vrot.lane.b32.xlu0 %v1771_v11, %s2302_s0 }
0x1f69   :  { %v1774_v12 = vpop.permute.xlu0 %1773 }
0x1f6a   :  { %v1776_v17 = vadd.f32 %v1774_v12, %v2822_v4  ;;  %v1824_v4 = vpop.f32.mrf.mxu2 }
0x1f6b   :  { %v1825_v24 = vadd.f32 %v2010_v39, %v1824_v4 }
0x1f6c   :  { %2106 = vtanh.f32 %v1776_v17 }
0x1f6d   :  { %2108 = vtanh.f32 %v1825_v24 }
0x1f72   :  { %v2107_v49 = vpop.eup %2106 }
0x1f73   :  { %1780 = vrot.lane.b32.xlu1 %v2107_v49, %s2304_s3  ;;  %v2109_v29 = vpop.eup %2108 }
0x1f74   :  { %v1832_v31 = vadd.f32 %v2109_v29, %v2723_v30 }
0x1f76   :  { %v1834_v32 = vmul.f32 %v1832_v31, %v2727_v13 }
0x1f78   :  { %v1838_v33 = vrot.slane %v1834_v32, 2  ;;  %v1841_v2 = vrot.slane %v1834_v32, 4  ;;  %v1844_v40 = vrot.slane %v1834_v32, 6 }
0x1f7a   :  { %v1840_v38 = vadd.f32 %v1838_v33, %v1834_v32 }
0x1f7c   :  { %v1843_v59 = vadd.f32 %v1841_v2, %v1840_v38 }
0x1f7e   :  { %v1846_v60 = vadd.f32 %v1844_v40, %v1843_v59 }
0x1fe5   :  { %v1781_v5 = vpop.permute.xlu1 %1780 }
0x1fe6   :  { %v1783_v21 = vmul.f32 %v1781_v5, %v1778_v7 }
0x1fe8   :  { %v1787_v19 = vadd.f32 %v1786_v18, %v1783_v21 }
0x1fea   :  { %v1793_v6 = vsel %vm1029_vm5, %v1792_v42, %v1787_v19 }
0x1feb   :  { %1801 = vrot.lane.b32.xlu0 %v1793_v6, %s2304_s3 }
0x205d   :  { %v1802_v22 = vpop.permute.xlu0 %1801 }
0x205e   :  { %1969 = vmatmul.msk.f32.gmra.mxu2 %vm207_vm0, %v1802_v22 }
0x20e1   :  { %v1827_v10 = vpop.f32.mrf.mxu2 }
0x20e2   :  { %v1828_v34 = vadd.f32 %v2010_v39, %v1827_v10 }
0x20e4   :  { %2110 = vtanh.f32 %v1828_v34 }
0x20ea   :  { %v2111_v15 = vpop.eup %2110 }
0x20eb   :  { %v1833_v58 = vadd.f32 %v2111_v15, %v2723_v30 }
0x20ed   :  { %v1835_v16 = vmul.f32 %v1833_v58, %v2736_v37 }
0x20ef   :  { %v1847_v63 = vadd.f32 %v1846_v60, %v1835_v16  ;;  %v1849_v42 = vrot.slane %v1835_v16, 2  ;;  %v1852_v61 = vrot.slane %v1835_v16, 4  ;;  %v1855_v13 = vrot.slane %v1835_v16, 6 }
0x20f1   :  { %v1851_v14 = vadd.f32 %v1849_v42, %v1847_v63 }
0x20f3   :  { %v1854_v23 = vadd.f32 %v1852_v61, %v1851_v14 }
0x20f5   :  { %v1857_v36 = vadd.f32 %v1855_v13, %v1854_v23 }
0x20f7   :  { %1970 = vmatmul.msk.f32.vlgmr.msrb.gmra.mxu3 %vm207_vm0, %v1857_v36  ;;  %vm1908_vm0 = vcmask 1024  }
0x217a   :  { %v1886_v35 = vpop.f32.mrf.mxu3 }
0x217b   :  { %v1887_v45 = vadd.f32 %v2011_v44, %v1886_v35 }
0x217d   :  { %v1971_v46 = vmul.f32 -1.442695, %v1887_v45 }
0x217f   :  { %2112 = vpow2.f32 %v1971_v46 }
0x2185   :  { %v2113_v0 = vpop.eup %2112 }
0x2186   :  { %v1892_v47 = vadd.f32 1.0, %v2113_v0 }
0x2188   :  { %2114 = vrcp.f32 %v1892_v47  ;;  %v1904_v51 = vand.u32 2147483648, %v1892_v47  ;;  %v1902_v43 = vand.u32 2147483647, %v1892_v47  ;;  %vm1898_vm12 = vweird.f32 %v1892_v47 }
0x218a   :  { %v1905_v54 = vor.u32 1.1754944e-38, %v1904_v51  ;;  %vm1903_vm14 = vcmp.eq.f32.partialorder %v1902_v43, 8.507059e+37 }
0x218e   :  { %v2115_v30 = vpop.eup %2114 }
0x218f   :  { %v1894_v37 = vmul.f32 %v2115_v30, %v1892_v47  ;;  %vm1899_vm5 = vweird.f32 %v2115_v30 }
0x2190   :  { %vm1900_vm13 = vmor %vm1898_vm12, %vm1899_vm5 }
0x2191   :  { %v1895_v48 = vsub.f32 1.0, %v1894_v37 }
0x2193   :  { %v1896_v52 = vmul.f32 %v2115_v30, %v1895_v48 }
0x2195   :  { %v1897_v53 = vadd.f32 %v2115_v30, %v1896_v52 }
0x2197   :  { %v1901_v55 = vsel %vm1900_vm13, %v2115_v30, %v1897_v53 }
0x2198   :  { %v1906_v56 = vsel %vm1903_vm14, %v1905_v54, %v1901_v55 }
0x2199   :  { %1909 = vst.msk [vmem:[%s2910_s17] sm:$0x3] %vm1908_vm0, %v1906_v56 }
0x219a   :  { %1914 = vsyncpa [#allocation4], 1 }
0x219b   :  { %1915 = vsyncpa [#allocation6], 1 }
0x219c   :  { %1916 = vsyncpa [#allocation9], 1 }
0x219d   :  { %1917 = vsyncpa [#allocation12], 1 }

</bundles_post_ra>
